<compile_context>
chip_gen: v7x
topology: tpu7x:2x2x1
jax: 0.10.0
libtpu: 0.0.40
codegen_flags: <defaults>
</compile_context>

<pallas_src>
import functools
import math

import jax
import jax.numpy as jnp
from jax import lax
from jax.experimental import pallas as pl
from jax.experimental.pallas import tpu as pltpu

_SQRT2 = math.sqrt(2.0)
_VMEM_LIMIT = 32 * 1024 * 1024  # safe scoped-VMEM budget across v5e / v6e / v7x


def _pick_row_tile(m, cap=256):
    """Largest row tile <= cap that divides m and is a multiple of 8 (else full m)."""
    for t in (256, 128, 64, 32, 16, 8):
        if t <= cap and t <= m and m % t == 0:
            return t
    return m


def _sigmoid(x):
    # EUP-friendly sigmoid: exp + approximate reciprocal (both off the VALU slot).
    return pl.reciprocal(1.0 + jnp.exp(-x), approx=True)


def _softplus(x):
    # numerically stable softplus (Mosaic-safe)
    return jnp.maximum(x, 0.0) + jnp.log(1.0 + jnp.exp(-jnp.abs(x)))


def _gelu(x):
    # exact erf-based GELU (torch.nn.GELU default)
    return 0.5 * x * (1.0 + lax.erf(x / _SQRT2))


def _layernorm(x, g, b):
    mu = jnp.mean(x, axis=-1, keepdims=True)
    var = jnp.mean(jnp.square(x - mu), axis=-1, keepdims=True)
    return (x - mu) * lax.rsqrt(var + 1e-5) * g + b


# --------------------------------------------------------------------------------------
# Kernel 1: synthetic backbone stub = global avg-pool over T*H*W + linear C -> d_model
# (row-tiled over B*V, bf16 MXU operands, f32 accumulate)
# --------------------------------------------------------------------------------------
def _pool_linear_kernel(x_ref, w_ref, b_ref, o_ref):
    x = x_ref[...].astype(jnp.float32)                    # (tm, C, S)
    pooled = jnp.mean(x, axis=-1)                         # (tm, C)
    y = jnp.dot(pooled.astype(jnp.bfloat16), w_ref[...],
                preferred_element_type=jnp.float32) + b_ref[...]
    o_ref[...] = y


# --------------------------------------------------------------------------------------
# Kernel 2: fused Mamba branch (in_proj -> causal conv + SiLU -> x_proj/dt_proj ->
# selective scan -> gate -> out_proj), grid over batch, everything resident in VMEM.
# --------------------------------------------------------------------------------------
def _mamba_kernel(feats_ref, wx_ref, wz_ref, convw_ref, convb_ref,
                  wdt_ref, wbt_ref, wct_ref, dtw_ref, dtb_ref,
                  at_ref, dvec_ref, wout_ref, o_ref, xp_scr, y_scr,
                  *, V, d_inner, d_state, d_conv):
    f = feats_ref[0].astype(jnp.bfloat16)                 # (V, d_model)

    # in_proj (bias-free), split into x / z branches via pre-split weights (no slices)
    x_in = jnp.dot(f, wx_ref[...], preferred_element_type=jnp.float32)   # (V, d_inner)
    z = jnp.dot(f, wz_ref[...], preferred_element_type=jnp.float32)      # (V, d_inner)

    # depthwise causal conv1d + SiLU; causal left-pad done in VMEM scratch (no jnp.pad)
    K = d_conv
    xp_scr[...] = jnp.zeros((V + K - 1, d_inner), jnp.float32)
    xp_scr[K - 1:K - 1 + V, :] = x_in
    acc = jnp.broadcast_to(convb_ref[...], (V, d_inner))
    for k in range(K):                                    # static unroll over conv taps
        acc = acc + xp_scr[k:k + V, :] * convw_ref[k:k + 1, :]
    xc = acc * _sigmoid(acc)                              # (V, d_inner), f32
    xc_b = xc.astype(jnp.bfloat16)

    # x_proj (bias-free): dt_low (V, dt_rank); B, C produced directly in (N, V) layout
    dt_low = jnp.dot(xc_b, wdt_ref[...], preferred_element_type=jnp.float32)
    BmT = jnp.einsum("nd,vd->nv", wbt_ref[...], xc_b,
                     preferred_element_type=jnp.float32)  # (N, V)
    CmT = jnp.einsum("nd,vd->nv", wct_ref[...], xc_b,
                     preferred_element_type=jnp.float32)  # (N, V)

    # dt_proj (+ bias), then softplus
    delta = _softplus(
        jnp.dot(dt_low.astype(jnp.bfloat16), dtw_ref[...],
                preferred_element_type=jnp.float32) + dtb_ref[...])       # (V, d_inner)

    # selective scan: state h laid out (N, d_inner) so d_inner rides the 128-lane axis
    A_T = at_ref[...]                                     # (N, d_inner), f32, negative
    h = jnp.zeros((d_state, d_inner), jnp.float32)
    for t in range(V):                                    # static unroll, V = #views (small)
        # TODO(synk): switch to lax.fori_loop + dynamic ref indexing if V grows large.
        delta_t = delta[t:t + 1, :]                       # (1, d_inner)
        u_t = xc[t:t + 1, :]                              # (1, d_inner)
        dA = jnp.exp(delta_t * A_T)                       # (N, d_inner)
        h = dA * h + (delta_t * u_t) * BmT[:, t:t + 1]    # (N, d_inner)
        y_scr[t:t + 1, :] = jnp.sum(h * CmT[:, t:t + 1], axis=0, keepdims=True)

    y = y_scr[...] + xc * dvec_ref[...]                   # D skip connection
    y = y * (z * _sigmoid(z))                             # gate with SiLU(z)
    o_ref[0] = jnp.dot(y.astype(jnp.bfloat16), wout_ref[...],
                       preferred_element_type=jnp.float32)


# --------------------------------------------------------------------------------------
# Kernel 3: LiftingNet fused = Linear + GELU + LayerNorm (row-tiled over B*V)
# --------------------------------------------------------------------------------------
def _lift_kernel(x_ref, w_ref, b_ref, g_ref, beta_ref, o_ref):
    y = jnp.dot(x_ref[...].astype(jnp.bfloat16), w_ref[...],
                preferred_element_type=jnp.float32) + b_ref[...]
    y = _gelu(y)
    o_ref[...] = _layernorm(y, g_ref[...], beta_ref[...])


# --------------------------------------------------------------------------------------
# Kernel 4: fused multi-head self-attention over views + out-proj + mean over views
# + final LayerNorm. Grid over batch; head split/merge done purely in-kernel.
# --------------------------------------------------------------------------------------
def _attn_pool_norm_kernel(x_ref, wqkv_ref, bqkv_ref, wo_ref, bo_ref,
                           g_ref, beta_ref, o_ref, merged_scr,
                           *, num_heads, dh, scale):
    x = x_ref[0].astype(jnp.bfloat16)                     # (V, d_model)
    V, d_model = x.shape
    xb = jnp.broadcast_to(x[None, :, :], (num_heads, V, d_model))
    # head-major QKV projection: one batched contraction over heads
    qkv = jnp.einsum("hvd,hdf->hvf", xb, wqkv_ref[...],
                     preferred_element_type=jnp.float32) + bqkv_ref[...]  # (H, V, 3*dh)
    q = (qkv[..., :dh] * scale).astype(jnp.bfloat16)      # scale folded into q
    k = qkv[..., dh:2 * dh].astype(jnp.bfloat16)
    v = qkv[..., 2 * dh:].astype(jnp.bfloat16)

    s = jnp.einsum("hqe,hke->hqk", q, k, preferred_element_type=jnp.float32)
    s = s - jnp.max(s, axis=-1, keepdims=True)
    p = jnp.exp(s)
    p = p * pl.reciprocal(jnp.sum(p, axis=-1, keepdims=True), approx=True)
    o = jnp.einsum("hqk,hke->hqe", p.astype(jnp.bfloat16), v,
                   preferred_element_type=jnp.float32)    # (H, V, dh)

    for h in range(num_heads):                            # static head-merge into (V, d_model)
        merged_scr[:, h * dh:(h + 1) * dh] = o[h]

    attn = jnp.dot(merged_scr[...].astype(jnp.bfloat16), wo_ref[...],
                   preferred_element_type=jnp.float32) + bo_ref[...]      # (V, d_model)
    pooled = jnp.mean(attn, axis=0, keepdims=True)        # (1, d_model)
    o_ref[0] = _layernorm(pooled, g_ref[...], beta_ref[...])


# --------------------------------------------------------------------------------------
# Parameter init (deterministic, synthetic) and forward pass
# --------------------------------------------------------------------------------------
def init_params(key, C, d_model, d_state, d_conv, expand):
    d_inner = expand * d_model
    dt_rank = math.ceil(d_model / 16)
    ks = iter(jax.random.split(key, 32))

    def n(shape, s=0.05):
        return (s * jax.random.normal(next(ks), shape)).astype(jnp.float32)

    params = dict(
        # synthetic backbone stub (self.model)
        backbone_w=n((C, d_model), 0.2), backbone_b=n((d_model,), 0.1),
        # Mamba
        in_proj_w=n((d_model, 2 * d_inner)),                      # bias=False in mamba_ssm
        conv_w=n((d_conv, d_inner), 0.2), conv_b=n((d_inner,), 0.1),
        x_proj_w=n((d_inner, dt_rank + 2 * d_state)),             # bias=False
        dt_proj_w=n((dt_rank, d_inner), 0.2), dt_proj_b=n((d_inner,), 0.1),
        A=-jnp.tile(jnp.arange(1, d_state + 1, dtype=jnp.float32)[None, :], (d_inner, 1)),
        D=jnp.ones((d_inner,), jnp.float32),
        out_proj_w=n((d_inner, d_model)),                         # bias=False
        # LiftingNet
        lift_w=n((d_model, d_model)), lift_b=n((d_model,), 0.1),
        lift_ln_g=jnp.ones((d_model,), jnp.float32),
        lift_ln_b=jnp.zeros((d_model,), jnp.float32),
        # MultiHeadAttention
        attn_qkv_w=n((d_model, 3 * d_model)), attn_qkv_b=n((3 * d_model,), 0.1),
        attn_out_w=n((d_model, d_model)), attn_out_b=n((d_model,), 0.1),
        # final norm
        norm_g=jnp.ones((d_model,), jnp.float32),
        norm_b=jnp.zeros((d_model,), jnp.float32),
    )
    return params


def view_mamba_aggregate2(params, mvimages, *, num_heads=4):
    B, V, C, T, H, W = mvimages.shape
    d_model = params["backbone_w"].shape[1]
    d_inner, d_state = params["A"].shape
    dt_rank = params["dt_proj_w"].shape[0]
    d_conv = params["conv_w"].shape[0]
    dh = d_model // num_heads
    bf16 = jnp.bfloat16

    # ---- one-time weight prep (tiny, const-folded under jit): bf16 MXU operands,
    #      pre-split/pre-transposed layouts so the kernels need no slices/transposes ----
    wb = params["backbone_w"].astype(bf16)
    in_w = params["in_proj_w"]
    wx = in_w[:, :d_inner].astype(bf16)
    wz = in_w[:, d_inner:].astype(bf16)
    xp_w = params["x_proj_w"]
    wdt = xp_w[:, :dt_rank].astype(bf16)
    wbt = xp_w[:, dt_rank:dt_rank + d_state].T.astype(bf16)       # (N, d_inner)
    wct = xp_w[:, dt_rank + d_state:].T.astype(bf16)              # (N, d_inner)
    dtw = params["dt_proj_w"].astype(bf16)
    a_t = params["A"].T.astype(jnp.float32)                       # (N, d_inner)
    wout = params["out_proj_w"].astype(bf16)
    lift_w = params["lift_w"].astype(bf16)

    wqkv = params["attn_qkv_w"]
    bqkv = params["attn_qkv_b"]

    def _head_w(w):   # (d_model, d_model) -> (H, d_model, dh)
        return w.reshape(d_model, num_heads, dh).transpose(1, 0, 2)

    def _head_b(b):   # (d_model,) -> (H, 1, dh)
        return b.reshape(num_heads, 1, dh)

    wqkv_r = jnp.concatenate(
        [_head_w(wqkv[:, :d_model]), _head_w(wqkv[:, d_model:2 * d_model]),
         _head_w(wqkv[:, 2 * d_model:])], axis=-1).astype(bf16)   # (H, d_model, 3*dh)
    bqkv_r = jnp.concatenate(
        [_head_b(bqkv[:d_model]), _head_b(bqkv[d_model:2 * d_model]),
         _head_b(bqkv[2 * d_model:])], axis=-1).astype(jnp.float32)  # (H, 1, 3*dh)
    wo = params["attn_out_w"].astype(bf16)

    # ---- backbone (self.model): pool over (T,H,W) + projection, then view(B, V, -1) ----
    M = B * V
    S = T * H * W
    x = mvimages.reshape(M, C, S).astype(jnp.float32)
    tm = _pick_row_tile(M)
    feats = pl.pallas_call(
        _pool_linear_kernel,
        out_shape=jax.ShapeDtypeStruct((M, d_model), jnp.float32),
        grid=(M // tm,),
        in_specs=[pl.BlockSpec((tm, C, S), lambda i: (i, 0, 0)),
                  pl.BlockSpec((C, d_model), lambda i: (0, 0)),
                  pl.BlockSpec((1, d_model), lambda i: (0, 0))],
        out_specs=pl.BlockSpec((tm, d_model), lambda i: (i, 0)),
        compiler_params=pltpu.CompilerParams(
            dimension_semantics=("parallel",), vmem_limit_bytes=_VMEM_LIMIT),
    )(x, wb, params["backbone_b"].reshape(1, d_model))

    # ---- fused Mamba block over the view axis (grid over batch, parallel) ----
    feats3 = feats.reshape(B, V, d_model)
    mamba_proj = pl.pallas_call(
        functools.partial(_mamba_kernel, V=V, d_inner=d_inner,
                          d_state=d_state, d_conv=d_conv),
        out_shape=jax.ShapeDtypeStruct((B, V, d_model), jnp.float32),
        grid=(B,),
        in_specs=[
            pl.BlockSpec((1, V, d_model), lambda b: (b, 0, 0)),
            pl.BlockSpec((d_model, d_inner), lambda b: (0, 0)),
            pl.BlockSpec((d_model, d_inner), lambda b: (0, 0)),
            pl.BlockSpec((d_conv, d_inner), lambda b: (0, 0)),
            pl.BlockSpec((1, d_inner), lambda b: (0, 0)),
            pl.BlockSpec((d_inner, dt_rank), lambda b: (0, 0)),
            pl.BlockSpec((d_state, d_inner), lambda b: (0, 0)),
            pl.BlockSpec((d_state, d_inner), lambda b: (0, 0)),
            pl.BlockSpec((dt_rank, d_inner), lambda b: (0, 0)),
            pl.BlockSpec((1, d_inner), lambda b: (0, 0)),
            pl.BlockSpec((d_state, d_inner), lambda b: (0, 0)),
            pl.BlockSpec((1, d_inner), lambda b: (0, 0)),
            pl.BlockSpec((d_inner, d_model), lambda b: (0, 0)),
        ],
        out_specs=pl.BlockSpec((1, V, d_model), lambda b: (b, 0, 0)),
        scratch_shapes=[pltpu.VMEM((V + d_conv - 1, d_inner), jnp.float32),
                        pltpu.VMEM((V, d_inner), jnp.float32)],
        compiler_params=pltpu.CompilerParams(
            dimension_semantics=("parallel",), vmem_limit_bytes=_VMEM_LIMIT),
    )(feats3, wx, wz, params["conv_w"], params["conv_b"].reshape(1, d_inner),
      wdt, wbt, wct, dtw, params["dt_proj_b"].reshape(1, d_inner),
      a_t, params["D"].reshape(1, d_inner), wout)

    # ---- LiftingNet: Linear + GELU + LayerNorm fused (row-tiled) ----
    tl = _pick_row_tile(M)
    lift = pl.pallas_call(
        _lift_kernel,
        out_shape=jax.ShapeDtypeStruct((M, d_model), jnp.float32),
        grid=(M // tl,),
        in_specs=[pl.BlockSpec((tl, d_model), lambda i: (i, 0)),
                  pl.BlockSpec((d_model, d_model), lambda i: (0, 0)),
                  pl.BlockSpec((1, d_model), lambda i: (0, 0)),
                  pl.BlockSpec((1, d_model), lambda i: (0, 0)),
                  pl.BlockSpec((1, d_model), lambda i: (0, 0))],
        out_specs=pl.BlockSpec((tl, d_model), lambda i: (i, 0)),
        compiler_params=pltpu.CompilerParams(
            dimension_semantics=("parallel",), vmem_limit_bytes=_VMEM_LIMIT),
    )(mamba_proj.reshape(M, d_model), lift_w,
      params["lift_b"].reshape(1, d_model),
      params["lift_ln_g"].reshape(1, d_model),
      params["lift_ln_b"].reshape(1, d_model))
    mamba_out = lift.reshape(B, V, d_model)

    # ---- fused MHA (self-attention over views) + out-proj + mean + final LayerNorm ----
    pooled = pl.pallas_call(
        functools.partial(_attn_pool_norm_kernel, num_heads=num_heads, dh=dh,
                          scale=1.0 / math.sqrt(dh)),
        out_shape=jax.ShapeDtypeStruct((B, 1, d_model), jnp.float32),
        grid=(B,),
        in_specs=[
            pl.BlockSpec((1, V, d_model), lambda b: (b, 0, 0)),
            pl.BlockSpec((num_heads, d_model, 3 * dh), lambda b: (0, 0, 0)),
            pl.BlockSpec((num_heads, 1, 3 * dh), lambda b: (0, 0, 0)),
            pl.BlockSpec((d_model, d_model), lambda b: (0, 0)),
            pl.BlockSpec((1, d_model), lambda b: (0, 0)),
            pl.BlockSpec((1, d_model), lambda b: (0, 0)),
            pl.BlockSpec((1, d_model), lambda b: (0, 0)),
        ],
        out_specs=pl.BlockSpec((1, 1, d_model), lambda b: (b, 0, 0)),
        scratch_shapes=[pltpu.VMEM((V, d_model), jnp.float32)],
        compiler_params=pltpu.CompilerParams(
            dimension_semantics=("parallel",), vmem_limit_bytes=_VMEM_LIMIT),
    )(mamba_out, wqkv_r, bqkv_r, wo,
      params["attn_out_b"].reshape(1, d_model),
      params["norm_g"].reshape(1, d_model),
      params["norm_b"].reshape(1, d_model))

    return pooled.reshape(B, d_model), mamba_out


if __name__ == "__main__":
    # small, forward-consistent shapes: B=2 batches, V=8 views (the Mamba/attention
    # sequence), C=4 channels, T=4 frames, H=W=8 spatial, d_model=32.
    B, V, C, T, H, W = 2, 8, 4, 4, 8, 8
    d_model, d_state, d_conv, expand, num_heads = 32, 8, 4, 2, 4

    root = jax.random.PRNGKey(0)
    k_in, k_par = jax.random.split(root)
    mvimages = jax.random.normal(k_in, (B, V, C, T, H, W), dtype=jnp.float32)
    params = init_params(k_par, C, d_model, d_state, d_conv, expand)

    fwd = jax.jit(functools.partial(view_mamba_aggregate2, num_heads=num_heads))
    pooled_view, mamba_out = fwd(params, mvimages)
    pooled_view = jax.block_until_ready(pooled_view)
    mamba_out = jax.block_until_ready(mamba_out)

    assert pooled_view.shape == (B, d_model)
    assert mamba_out.shape == (B, V, d_model)
    assert bool(jnp.all(jnp.isfinite(pooled_view))) and bool(jnp.all(jnp.isfinite(mamba_out)))
    print("KERNEL_OK")
</pallas_src>

<mosaic_0001>
module attributes {stable_mosaic.version = 11 : i64} {
  func.func @_pool_linear_kernel(%arg0: i32, %arg1: memref<16x4x256xf32, #tpu.memory_space<vmem>>, %arg2: memref<4x32xbf16, #tpu.memory_space<vmem>>, %arg3: memref<1x32xf32, #tpu.memory_space<vmem>>, %arg4: memref<16x32xf32, #tpu.memory_space<vmem>>) attributes {dimension_semantics = [#tpu.dimension_semantics<parallel>], iteration_bounds = array<i64: 1>, scalar_prefetch = 0 : i64, scratch_operands = 0 : i64, tpu.core_type = #tpu.core_type<tc>, window_params = [{transform_indices = @transform_0, window_bounds = array<i64: 16, 4, 256>}, {pipeline_mode = #tpu.pipeline_mode<synchronous>, transform_indices = @transform_1, window_bounds = array<i64: 4, 32>}, {pipeline_mode = #tpu.pipeline_mode<synchronous>, transform_indices = @transform_2, window_bounds = array<i64: 1, 32>}, {transform_indices = @transform_3, window_bounds = array<i64: 16, 32>}]} {
    %c0 = arith.constant 0 : index
    %c0_0 = arith.constant 0 : index
    %c0_1 = arith.constant 0 : index
    %0 = vector.load %arg1[%c0, %c0_0, %c0_1] : memref<16x4x256xf32, #tpu.memory_space<vmem>>, vector<16x4x256xf32>
    %cst = arith.constant dense<0.000000e+00> : vector<16x4xf32>
    %1 = vector.multi_reduction <add>, %0, %cst [2] : vector<16x4x256xf32> to vector<16x4xf32>
    %cst_2 = arith.constant 2.560000e+02 : f32
    %2 = vector.broadcast %cst_2 : f32 to vector<16x4xf32>
    %3 = arith.divf %1, %2 : vector<16x4xf32>
    %4 = arith.truncf %3 : vector<16x4xf32> to vector<16x4xbf16>
    %c0_3 = arith.constant 0 : index
    %c0_4 = arith.constant 0 : index
    %5 = vector.load %arg2[%c0_3, %c0_4] : memref<4x32xbf16, #tpu.memory_space<vmem>>, vector<4x32xbf16>
    %cst_5 = arith.constant dense<0.000000e+00> : vector<16x32xf32>
    %6 = tpu.matmul %4, %5, %cst_5 {dimension_numbers = #tpu.dot_dimension_numbers<[1], [0], [0], [1], [0, 0, 1, 1], [], []>} : vector<16x4xbf16>, vector<4x32xbf16>, vector<16x32xf32> -> vector<16x32xf32>
    %c0_6 = arith.constant 0 : index
    %c0_7 = arith.constant 0 : index
    %7 = vector.load %arg3[%c0_6, %c0_7] : memref<1x32xf32, #tpu.memory_space<vmem>>, vector<1x32xf32>
    %8 = vector.broadcast %7 : vector<1x32xf32> to vector<16x32xf32>
    %9 = arith.addf %6, %8 : vector<16x32xf32>
    %c0_8 = arith.constant 0 : index
    %c0_9 = arith.constant 0 : index
    %10 = vector.load %arg4[%c0_8, %c0_9] : memref<16x32xf32, #tpu.memory_space<vmem>>, vector<16x32xf32>
    tpu.vector_store %arg4[%c0_8, %c0_9], %9 {strides = array<i32>} : memref<16x32xf32, #tpu.memory_space<vmem>>, vector<16x32xf32>,
    return
  }
  func.func @transform_0(%arg0: i32) -> (i32, i32, i32) {
    %c0_i32 = arith.constant 0 : i32
    %c0_i32_0 = arith.constant 0 : i32
    %c0_i32_1 = arith.constant 0 : i32
    return %arg0, %c0_i32, %c0_i32_0 : i32, i32, i32
  }
  func.func @transform_1(%arg0: i32) -> (i32, i32) {
    %c0_i32 = arith.constant 0 : i32
    %c0_i32_0 = arith.constant 0 : i32
    %c0_i32_1 = arith.constant 0 : i32
    return %c0_i32, %c0_i32_0 : i32, i32
  }
  func.func @transform_2(%arg0: i32) -> (i32, i32) {
    %c0_i32 = arith.constant 0 : i32
    %c0_i32_0 = arith.constant 0 : i32
    %c0_i32_1 = arith.constant 0 : i32
    return %c0_i32, %c0_i32_0 : i32, i32
  }
  func.func @transform_3(%arg0: i32) -> (i32, i32) {
    %c0_i32 = arith.constant 0 : i32
    %c0_i32_0 = arith.constant 0 : i32
    return %arg0, %c0_i32 : i32, i32
  }
}

module attributes {stable_mosaic.version = 11 : i64} {
  func.func @_lift_kernel(%arg0: i32, %arg1: memref<16x32xf32, #tpu.memory_space<vmem>>, %arg2: memref<32x32xbf16, #tpu.memory_space<vmem>>, %arg3: memref<1x32xf32, #tpu.memory_space<vmem>>, %arg4: memref<1x32xf32, #tpu.memory_space<vmem>>, %arg5: memref<1x32xf32, #tpu.memory_space<vmem>>, %arg6: memref<16x32xf32, #tpu.memory_space<vmem>>) attributes {dimension_semantics = [#tpu.dimension_semantics<parallel>], iteration_bounds = array<i64: 1>, scalar_prefetch = 0 : i64, scratch_operands = 0 : i64, tpu.core_type = #tpu.core_type<tc>, window_params = [{transform_indices = @transform_0, window_bounds = array<i64: 16, 32>}, {pipeline_mode = #tpu.pipeline_mode<synchronous>, transform_indices = @transform_1, window_bounds = array<i64: 32, 32>}, {pipeline_mode = #tpu.pipeline_mode<synchronous>, transform_indices = @transform_2, window_bounds = array<i64: 1, 32>}, {pipeline_mode = #tpu.pipeline_mode<synchronous>, transform_indices = @transform_3, window_bounds = array<i64: 1, 32>}, {pipeline_mode = #tpu.pipeline_mode<synchronous>, transform_indices = @transform_4, window_bounds = array<i64: 1, 32>}, {transform_indices = @transform_5, window_bounds = array<i64: 16, 32>}]} {
    %c0 = arith.constant 0 : index
    %c0_0 = arith.constant 0 : index
    %0 = vector.load %arg1[%c0, %c0_0] : memref<16x32xf32, #tpu.memory_space<vmem>>, vector<16x32xf32>
    %1 = arith.truncf %0 : vector<16x32xf32> to vector<16x32xbf16>
    %c0_1 = arith.constant 0 : index
    %c0_2 = arith.constant 0 : index
    %2 = vector.load %arg2[%c0_1, %c0_2] : memref<32x32xbf16, #tpu.memory_space<vmem>>, vector<32x32xbf16>
    %cst = arith.constant dense<0.000000e+00> : vector<16x32xf32>
    %3 = tpu.matmul %1, %2, %cst {dimension_numbers = #tpu.dot_dimension_numbers<[1], [0], [0], [1], [0, 0, 1, 1], [], []>} : vector<16x32xbf16>, vector<32x32xbf16>, vector<16x32xf32> -> vector<16x32xf32>
    %c0_3 = arith.constant 0 : index
    %c0_4 = arith.constant 0 : index
    %4 = vector.load %arg3[%c0_3, %c0_4] : memref<1x32xf32, #tpu.memory_space<vmem>>, vector<1x32xf32>
    %5 = vector.broadcast %4 : vector<1x32xf32> to vector<16x32xf32>
    %6 = arith.addf %3, %5 : vector<16x32xf32>
    %cst_5 = arith.constant 5.000000e-01 : f32
    %7 = vector.broadcast %cst_5 : f32 to vector<16x32xf32>
    %8 = arith.mulf %7, %6 : vector<16x32xf32>
    %cst_6 = arith.constant 1.41421354 : f32
    %9 = vector.broadcast %cst_6 : f32 to vector<16x32xf32>
    %10 = arith.divf %6, %9 : vector<16x32xf32>
    %11 = math.erf %10 : vector<16x32xf32>
    %cst_7 = arith.constant 1.000000e+00 : f32
    %12 = vector.broadcast %cst_7 : f32 to vector<16x32xf32>
    %13 = arith.addf %12, %11 : vector<16x32xf32>
    %14 = arith.mulf %8, %13 : vector<16x32xf32>
    %c0_8 = arith.constant 0 : index
    %c0_9 = arith.constant 0 : index
    %15 = vector.load %arg4[%c0_8, %c0_9] : memref<1x32xf32, #tpu.memory_space<vmem>>, vector<1x32xf32>
    %c0_10 = arith.constant 0 : index
    %c0_11 = arith.constant 0 : index
    %16 = vector.load %arg5[%c0_10, %c0_11] : memref<1x32xf32, #tpu.memory_space<vmem>>, vector<1x32xf32>
    %cst_12 = arith.constant dense<0.000000e+00> : vector<16xf32>
    %17 = vector.multi_reduction <add>, %14, %cst_12 [1] : vector<16x32xf32> to vector<16xf32>
    %18 = vector.shape_cast %17 : vector<16xf32> to vector<16x1xf32>
    %cst_13 = arith.constant 3.200000e+01 : f32
    %19 = vector.broadcast %cst_13 : f32 to vector<16x1xf32>
    %20 = arith.divf %18, %19 : vector<16x1xf32>
    %21 = vector.broadcast %20 : vector<16x1xf32> to vector<16x32xf32>
    %22 = arith.subf %14, %21 : vector<16x32xf32>
    %23 = arith.mulf %22, %22 : vector<16x32xf32>
    %cst_14 = arith.constant dense<0.000000e+00> : vector<16xf32>
    %24 = vector.multi_reduction <add>, %23, %cst_14 [1] : vector<16x32xf32> to vector<16xf32>
    %25 = vector.shape_cast %24 : vector<16xf32> to vector<16x1xf32>
    %cst_15 = arith.constant 3.200000e+01 : f32
    %26 = vector.broadcast %cst_15 : f32 to vector<16x1xf32>
    %27 = arith.divf %25, %26 : vector<16x1xf32>
    %28 = vector.broadcast %20 : vector<16x1xf32> to vector<16x32xf32>
    %29 = arith.subf %14, %28 : vector<16x32xf32>
    %cst_16 = arith.constant 9.99999974E-6 : f32
    %30 = vector.broadcast %cst_16 : f32 to vector<16x1xf32>
    %31 = arith.addf %27, %30 : vector<16x1xf32>
    %32 = math.rsqrt %31 : vector<16x1xf32>
    %33 = vector.broadcast %32 : vector<16x1xf32> to vector<16x32xf32>
    %34 = arith.mulf %29, %33 : vector<16x32xf32>
    %35 = vector.broadcast %15 : vector<1x32xf32> to vector<16x32xf32>
    %36 = arith.mulf %34, %35 : vector<16x32xf32>
    %37 = vector.broadcast %16 : vector<1x32xf32> to vector<16x32xf32>
    %38 = arith.addf %36, %37 : vector<16x32xf32>
    %c0_17 = arith.constant 0 : index
    %c0_18 = arith.constant 0 : index
    %39 = vector.load %arg6[%c0_17, %c0_18] : memref<16x32xf32, #tpu.memory_space<vmem>>, vector<16x32xf32>
    tpu.vector_store %arg6[%c0_17, %c0_18], %38 {strides = array<i32>} : memref<16x32xf32, #tpu.memory_space<vmem>>, vector<16x32xf32>,
    return
  }
  func.func @transform_0(%arg0: i32) -> (i32, i32) {
    %c0_i32 = arith.constant 0 : i32
    %c0_i32_0 = arith.constant 0 : i32
    return %arg0, %c0_i32 : i32, i32
  }
  func.func @transform_1(%arg0: i32) -> (i32, i32) {
    %c0_i32 = arith.constant 0 : i32
    %c0_i32_0 = arith.constant 0 : i32
    %c0_i32_1 = arith.constant 0 : i32
    return %c0_i32, %c0_i32_0 : i32, i32
  }
  func.func @transform_2(%arg0: i32) -> (i32, i32) {
    %c0_i32 = arith.constant 0 : i32
    %c0_i32_0 = arith.constant 0 : i32
    %c0_i32_1 = arith.constant 0 : i32
    return %c0_i32, %c0_i32_0 : i32, i32
  }
  func.func @transform_3(%arg0: i32) -> (i32, i32) {
    %c0_i32 = arith.constant 0 : i32
    %c0_i32_0 = arith.constant 0 : i32
    %c0_i32_1 = arith.constant 0 : i32
    return %c0_i32, %c0_i32_0 : i32, i32
  }
  func.func @transform_4(%arg0: i32) -> (i32, i32) {
    %c0_i32 = arith.constant 0 : i32
    %c0_i32_0 = arith.constant 0 : i32
    %c0_i32_1 = arith.constant 0 : i32
    return %c0_i32, %c0_i32_0 : i32, i32
  }
  func.func @transform_5(%arg0: i32) -> (i32, i32) {
    %c0_i32 = arith.constant 0 : i32
    %c0_i32_0 = arith.constant 0 : i32
    return %arg0, %c0_i32 : i32, i32
  }
}

module attributes {stable_mosaic.version = 11 : i64} {
  func.func @_mamba_kernel(%arg0: i32, %arg1: memref<1x8x32xf32, #tpu.memory_space<vmem>>, %arg2: memref<32x64xbf16, #tpu.memory_space<vmem>>, %arg3: memref<32x64xbf16, #tpu.memory_space<vmem>>, %arg4: memref<4x64xf32, #tpu.memory_space<vmem>>, %arg5: memref<1x64xf32, #tpu.memory_space<vmem>>, %arg6: memref<64x2xbf16, #tpu.memory_space<vmem>>, %arg7: memref<8x64xbf16, #tpu.memory_space<vmem>>, %arg8: memref<8x64xbf16, #tpu.memory_space<vmem>>, %arg9: memref<2x64xbf16, #tpu.memory_space<vmem>>, %arg10: memref<1x64xf32, #tpu.memory_space<vmem>>, %arg11: memref<8x64xf32, #tpu.memory_space<vmem>>, %arg12: memref<1x64xf32, #tpu.memory_space<vmem>>, %arg13: memref<64x32xbf16, #tpu.memory_space<vmem>>, %arg14: memref<1x8x32xf32, #tpu.memory_space<vmem>>, %arg15: memref<11x64xf32, #tpu.memory_space<vmem>>, %arg16: memref<8x64xf32, #tpu.memory_space<vmem>>) attributes {dimension_semantics = [#tpu.dimension_semantics<parallel>], iteration_bounds = array<i64: 2>, scalar_prefetch = 0 : i64, scratch_operands = 2 : i64, tpu.core_type = #tpu.core_type<tc>, window_params = [{transform_indices = @transform_0, window_bounds = array<i64: 1, 8, 32>}, {pipeline_mode = #tpu.pipeline_mode<synchronous>, transform_indices = @transform_1, window_bounds = array<i64: 32, 64>}, {pipeline_mode = #tpu.pipeline_mode<synchronous>, transform_indices = @transform_2, window_bounds = array<i64: 32, 64>}, {pipeline_mode = #tpu.pipeline_mode<synchronous>, transform_indices = @transform_3, window_bounds = array<i64: 4, 64>}, {pipeline_mode = #tpu.pipeline_mode<synchronous>, transform_indices = @transform_4, window_bounds = array<i64: 1, 64>}, {pipeline_mode = #tpu.pipeline_mode<synchronous>, transform_indices = @transform_5, window_bounds = array<i64: 64, 2>}, {pipeline_mode = #tpu.pipeline_mode<synchronous>, transform_indices = @transform_6, window_bounds = array<i64: 8, 64>}, {pipeline_mode = #tpu.pipeline_mode<synchronous>, transform_indices = @transform_7, window_bounds = array<i64: 8, 64>}, {pipeline_mode = #tpu.pipeline_mode<synchronous>, transform_indices = @transform_8, window_bounds = array<i64: 2, 64>}, {pipeline_mode = #tpu.pipeline_mode<synchronous>, transform_indices = @transform_9, window_bounds = array<i64: 1, 64>}, {pipeline_mode = #tpu.pipeline_mode<synchronous>, transform_indices = @transform_10, window_bounds = array<i64: 8, 64>}, {pipeline_mode = #tpu.pipeline_mode<synchronous>, transform_indices = @transform_11, window_bounds = array<i64: 1, 64>}, {pipeline_mode = #tpu.pipeline_mode<synchronous>, transform_indices = @transform_12, window_bounds = array<i64: 64, 32>}, {transform_indices = @transform_13, window_bounds = array<i64: 1, 8, 32>}]} {
    %c0 = arith.constant 0 : index
    %c0_0 = arith.constant 0 : index
    %c0_1 = arith.constant 0 : index
    %0 = vector.load %arg1[%c0, %c0_0, %c0_1] : memref<1x8x32xf32, #tpu.memory_space<vmem>>, vector<1x8x32xf32>
    %1 = vector.shape_cast %0 : vector<1x8x32xf32> to vector<8x32xf32>
    %2 = arith.truncf %1 : vector<8x32xf32> to vector<8x32xbf16>
    %c0_2 = arith.constant 0 : index
    %c0_3 = arith.constant 0 : index
    %3 = vector.load %arg2[%c0_2, %c0_3] : memref<32x64xbf16, #tpu.memory_space<vmem>>, vector<32x64xbf16>
    %cst = arith.constant dense<0.000000e+00> : vector<8x64xf32>
    %4 = tpu.matmul %2, %3, %cst {dimension_numbers = #tpu.dot_dimension_numbers<[1], [0], [0], [1], [0, 0, 1, 1], [], []>} : vector<8x32xbf16>, vector<32x64xbf16>, vector<8x64xf32> -> vector<8x64xf32>
    %c0_4 = arith.constant 0 : index
    %c0_5 = arith.constant 0 : index
    %5 = vector.load %arg3[%c0_4, %c0_5] : memref<32x64xbf16, #tpu.memory_space<vmem>>, vector<32x64xbf16>
    %cst_6 = arith.constant dense<0.000000e+00> : vector<8x64xf32>
    %6 = tpu.matmul %2, %5, %cst_6 {dimension_numbers = #tpu.dot_dimension_numbers<[1], [0], [0], [1], [0, 0, 1, 1], [], []>} : vector<8x32xbf16>, vector<32x64xbf16>, vector<8x64xf32> -> vector<8x64xf32>
    %cst_7 = arith.constant 0.000000e+00 : f32
    %7 = vector.broadcast %cst_7 : f32 to vector<11x64xf32>
    %c0_8 = arith.constant 0 : index
    %c0_9 = arith.constant 0 : index
    %8 = vector.load %arg15[%c0_8, %c0_9] : memref<11x64xf32, #tpu.memory_space<vmem>>, vector<11x64xf32>
    tpu.vector_store %arg15[%c0_8, %c0_9], %7 {strides = array<i32>} : memref<11x64xf32, #tpu.memory_space<vmem>>, vector<11x64xf32>,
    %c3 = arith.constant 3 : index
    %c0_10 = arith.constant 0 : index
    %9 = vector.load %arg15[%c3, %c0_10] : memref<11x64xf32, #tpu.memory_space<vmem>>, vector<8x64xf32>
    tpu.vector_store %arg15[%c3, %c0_10], %4 {strides = array<i32>} : memref<11x64xf32, #tpu.memory_space<vmem>>, vector<8x64xf32>,
    %c0_11 = arith.constant 0 : index
    %c0_12 = arith.constant 0 : index
    %10 = vector.load %arg5[%c0_11, %c0_12] : memref<1x64xf32, #tpu.memory_space<vmem>>, vector<1x64xf32>
    %11 = vector.shape_cast %10 : vector<1x64xf32> to vector<1x64xf32>
    %12 = vector.broadcast %11 : vector<1x64xf32> to vector<8x64xf32>
    %c0_13 = arith.constant 0 : index
    %c0_14 = arith.constant 0 : index
    %13 = vector.load %arg15[%c0_13, %c0_14] : memref<11x64xf32, #tpu.memory_space<vmem>>, vector<8x64xf32>
    %c0_15 = arith.constant 0 : index
    %c0_16 = arith.constant 0 : index
    %14 = vector.load %arg4[%c0_15, %c0_16] : memref<4x64xf32, #tpu.memory_space<vmem>>, vector<1x64xf32>
    %15 = vector.broadcast %14 : vector<1x64xf32> to vector<8x64xf32>
    %16 = arith.mulf %13, %15 : vector<8x64xf32>
    %17 = arith.addf %12, %16 : vector<8x64xf32>
    %c1 = arith.constant 1 : index
    %c0_17 = arith.constant 0 : index
    %18 = vector.load %arg15[%c1, %c0_17] : memref<11x64xf32, #tpu.memory_space<vmem>>, vector<8x64xf32>
    %c1_18 = arith.constant 1 : index
    %c0_19 = arith.constant 0 : index
    %19 = vector.load %arg4[%c1_18, %c0_19] : memref<4x64xf32, #tpu.memory_space<vmem>>, vector<1x64xf32>
    %20 = vector.broadcast %19 : vector<1x64xf32> to vector<8x64xf32>
    %21 = arith.mulf %18, %20 : vector<8x64xf32>
    %22 = arith.addf %17, %21 : vector<8x64xf32>
    %c2 = arith.constant 2 : index
    %c0_20 = arith.constant 0 : index
    %23 = vector.load %arg15[%c2, %c0_20] : memref<11x64xf32, #tpu.memory_space<vmem>>, vector<8x64xf32>
    %c2_21 = arith.constant 2 : index
    %c0_22 = arith.constant 0 : index
    %24 = vector.load %arg4[%c2_21, %c0_22] : memref<4x64xf32, #tpu.memory_space<vmem>>, vector<1x64xf32>
    %25 = vector.broadcast %24 : vector<1x64xf32> to vector<8x64xf32>
    %26 = arith.mulf %23, %25 : vector<8x64xf32>
    %27 = arith.addf %22, %26 : vector<8x64xf32>
    %c3_23 = arith.constant 3 : index
    %c0_24 = arith.constant 0 : index
    %28 = vector.load %arg15[%c3_23, %c0_24] : memref<11x64xf32, #tpu.memory_space<vmem>>, vector<8x64xf32>
    %c3_25 = arith.constant 3 : index
    %c0_26 = arith.constant 0 : index
    %29 = vector.load %arg4[%c3_25, %c0_26] : memref<4x64xf32, #tpu.memory_space<vmem>>, vector<1x64xf32>
    %30 = vector.broadcast %29 : vector<1x64xf32> to vector<8x64xf32>
    %31 = arith.mulf %28, %30 : vector<8x64xf32>
    %32 = arith.addf %27, %31 : vector<8x64xf32>
    %cst_27 = arith.constant 0.000000e+00 : f32
    %33 = vector.broadcast %cst_27 : f32 to vector<8x64xf32>
    %34 = arith.subf %33, %32 : vector<8x64xf32>
    %35 = math.exp %34 : vector<8x64xf32>
    %cst_28 = arith.constant 1.000000e+00 : f32
    %36 = vector.broadcast %cst_28 : f32 to vector<8x64xf32>
    %37 = arith.addf %36, %35 : vector<8x64xf32>
    %38 = tpu.reciprocal %37 {approx = true} : vector<8x64xf32> -> vector<8x64xf32>
    %39 = arith.mulf %32, %38 : vector<8x64xf32>
    %40 = arith.truncf %39 : vector<8x64xf32> to vector<8x64xbf16>
    %c0_29 = arith.constant 0 : index
    %c0_30 = arith.constant 0 : index
    %41 = vector.load %arg6[%c0_29, %c0_30] : memref<64x2xbf16, #tpu.memory_space<vmem>>, vector<64x2xbf16>
    %cst_31 = arith.constant dense<0.000000e+00> : vector<8x2xf32>
    %42 = tpu.matmul %40, %41, %cst_31 {dimension_numbers = #tpu.dot_dimension_numbers<[1], [0], [0], [1], [0, 0, 1, 1], [], []>} : vector<8x64xbf16>, vector<64x2xbf16>, vector<8x2xf32> -> vector<8x2xf32>
    %c0_32 = arith.constant 0 : index
    %c0_33 = arith.constant 0 : index
    %43 = vector.load %arg7[%c0_32, %c0_33] : memref<8x64xbf16, #tpu.memory_space<vmem>>, vector<8x64xbf16>
    "tpu.trace_start"() <{level = 10 : i32, message = "nd,vd->nv"}> : () -> ()
    %cst_34 = arith.constant dense<0.000000e+00> : vector<8x8xf32>
    %44 = tpu.matmul %43, %40, %cst_34 {dimension_numbers = #tpu.dot_dimension_numbers<[1], [1], [0], [0], [0, 0, 1, 0], [], []>} : vector<8x64xbf16>, vector<8x64xbf16>, vector<8x8xf32> -> vector<8x8xf32>
    "tpu.trace_stop"() : () -> ()
    %c0_35 = arith.constant 0 : index
    %c0_36 = arith.constant 0 : index
    %45 = vector.load %arg8[%c0_35, %c0_36] : memref<8x64xbf16, #tpu.memory_space<vmem>>, vector<8x64xbf16>
    "tpu.trace_start"() <{level = 10 : i32, message = "nd,vd->nv"}> : () -> ()
    %cst_37 = arith.constant dense<0.000000e+00> : vector<8x8xf32>
    %46 = tpu.matmul %45, %40, %cst_37 {dimension_numbers = #tpu.dot_dimension_numbers<[1], [1], [0], [0], [0, 0, 1, 0], [], []>} : vector<8x64xbf16>, vector<8x64xbf16>, vector<8x8xf32> -> vector<8x8xf32>
    "tpu.trace_stop"() : () -> ()
    %47 = arith.truncf %42 : vector<8x2xf32> to vector<8x2xbf16>
    %c0_38 = arith.constant 0 : index
    %c0_39 = arith.constant 0 : index
    %48 = vector.load %arg9[%c0_38, %c0_39] : memref<2x64xbf16, #tpu.memory_space<vmem>>, vector<2x64xbf16>
    %cst_40 = arith.constant dense<0.000000e+00> : vector<8x64xf32>
    %49 = tpu.matmul %47, %48, %cst_40 {dimension_numbers = #tpu.dot_dimension_numbers<[1], [0], [0], [1], [0, 0, 1, 1], [], []>} : vector<8x2xbf16>, vector<2x64xbf16>, vector<8x64xf32> -> vector<8x64xf32>
    %c0_41 = arith.constant 0 : index
    %c0_42 = arith.constant 0 : index
    %50 = vector.load %arg10[%c0_41, %c0_42] : memref<1x64xf32, #tpu.memory_space<vmem>>, vector<1x64xf32>
    %51 = vector.broadcast %50 : vector<1x64xf32> to vector<8x64xf32>
    %52 = arith.addf %49, %51 : vector<8x64xf32>
    %cst_43 = arith.constant 0.000000e+00 : f32
    %53 = vector.broadcast %cst_43 : f32 to vector<8x64xf32>
    %54 = arith.maximumf %52, %53 : vector<8x64xf32>
    %55 = math.absf %52 : vector<8x64xf32>
    %cst_44 = arith.constant 0.000000e+00 : f32
    %56 = vector.broadcast %cst_44 : f32 to vector<8x64xf32>
    %57 = arith.subf %56, %55 : vector<8x64xf32>
    %58 = math.exp %57 : vector<8x64xf32>
    %cst_45 = arith.constant 1.000000e+00 : f32
    %59 = vector.broadcast %cst_45 : f32 to vector<8x64xf32>
    %60 = arith.addf %59, %58 : vector<8x64xf32>
    %61 = math.log %60 : vector<8x64xf32>
    %62 = arith.addf %54, %61 : vector<8x64xf32>
    %c0_46 = arith.constant 0 : index
    %c0_47 = arith.constant 0 : index
    %63 = vector.load %arg11[%c0_46, %c0_47] : memref<8x64xf32, #tpu.memory_space<vmem>>, vector<8x64xf32>
    %cst_48 = arith.constant 0.000000e+00 : f32
    %64 = vector.broadcast %cst_48 : f32 to vector<8x64xf32>
    %65 = vector.extract_strided_slice %62 {offsets = [0, 0], sizes = [1, 64], strides = [1, 1]} : vector<8x64xf32> to vector<1x64xf32>
    %66 = vector.extract_strided_slice %39 {offsets = [0, 0], sizes = [1, 64], strides = [1, 1]} : vector<8x64xf32> to vector<1x64xf32>
    %67 = vector.broadcast %65 : vector<1x64xf32> to vector<8x64xf32>
    %68 = arith.mulf %67, %63 : vector<8x64xf32>
    %69 = math.exp %68 : vector<8x64xf32>
    %70 = arith.mulf %69, %64 : vector<8x64xf32>
    %71 = arith.mulf %65, %66 : vector<1x64xf32>
    %72 = vector.extract_strided_slice %44 {offsets = [0, 0], sizes = [8, 1], strides = [1, 1]} : vector<8x8xf32> to vector<8x1xf32>
    %73 = vector.broadcast %71 : vector<1x64xf32> to vector<8x64xf32>
    %74 = vector.broadcast %72 : vector<8x1xf32> to vector<8x64xf32>
    %75 = arith.mulf %73, %74 : vector<8x64xf32>
    %76 = arith.addf %70, %75 : vector<8x64xf32>
    %77 = vector.extract_strided_slice %46 {offsets = [0, 0], sizes = [8, 1], strides = [1, 1]} : vector<8x8xf32> to vector<8x1xf32>
    %78 = vector.broadcast %77 : vector<8x1xf32> to vector<8x64xf32>
    %79 = arith.mulf %76, %78 : vector<8x64xf32>
    %cst_49 = arith.constant dense<0.000000e+00> : vector<64xf32>
    %80 = vector.multi_reduction <add>, %79, %cst_49 [0] : vector<8x64xf32> to vector<64xf32>
    %81 = vector.shape_cast %80 : vector<64xf32> to vector<1x64xf32>
    %c0_50 = arith.constant 0 : index
    %c0_51 = arith.constant 0 : index
    %82 = vector.load %arg16[%c0_50, %c0_51] : memref<8x64xf32, #tpu.memory_space<vmem>>, vector<1x64xf32>
    tpu.vector_store %arg16[%c0_50, %c0_51], %81 {strides = array<i32>} : memref<8x64xf32, #tpu.memory_space<vmem>>, vector<1x64xf32>,
    %83 = vector.extract_strided_slice %62 {offsets = [1, 0], sizes = [1, 64], strides = [1, 1]} : vector<8x64xf32> to vector<1x64xf32>
    %84 = vector.extract_strided_slice %39 {offsets = [1, 0], sizes = [1, 64], strides = [1, 1]} : vector<8x64xf32> to vector<1x64xf32>
    %85 = vector.broadcast %83 : vector<1x64xf32> to vector<8x64xf32>
    %86 = arith.mulf %85, %63 : vector<8x64xf32>
    %87 = math.exp %86 : vector<8x64xf32>
    %88 = arith.mulf %87, %76 : vector<8x64xf32>
    %89 = arith.mulf %83, %84 : vector<1x64xf32>
    %90 = vector.extract_strided_slice %44 {offsets = [0, 1], sizes = [8, 1], strides = [1, 1]} : vector<8x8xf32> to vector<8x1xf32>
    %91 = vector.broadcast %89 : vector<1x64xf32> to vector<8x64xf32>
    %92 = vector.broadcast %90 : vector<8x1xf32> to vector<8x64xf32>
    %93 = arith.mulf %91, %92 : vector<8x64xf32>
    %94 = arith.addf %88, %93 : vector<8x64xf32>
    %95 = vector.extract_strided_slice %46 {offsets = [0, 1], sizes = [8, 1], strides = [1, 1]} : vector<8x8xf32> to vector<8x1xf32>
    %96 = vector.broadcast %95 : vector<8x1xf32> to vector<8x64xf32>
    %97 = arith.mulf %94, %96 : vector<8x64xf32>
    %cst_52 = arith.constant dense<0.000000e+00> : vector<64xf32>
    %98 = vector.multi_reduction <add>, %97, %cst_52 [0] : vector<8x64xf32> to vector<64xf32>
    %99 = vector.shape_cast %98 : vector<64xf32> to vector<1x64xf32>
    %c1_53 = arith.constant 1 : index
    %c0_54 = arith.constant 0 : index
    %100 = vector.load %arg16[%c1_53, %c0_54] : memref<8x64xf32, #tpu.memory_space<vmem>>, vector<1x64xf32>
    tpu.vector_store %arg16[%c1_53, %c0_54], %99 {strides = array<i32>} : memref<8x64xf32, #tpu.memory_space<vmem>>, vector<1x64xf32>,
    %101 = vector.extract_strided_slice %62 {offsets = [2, 0], sizes = [1, 64], strides = [1, 1]} : vector<8x64xf32> to vector<1x64xf32>
    %102 = vector.extract_strided_slice %39 {offsets = [2, 0], sizes = [1, 64], strides = [1, 1]} : vector<8x64xf32> to vector<1x64xf32>
    %103 = vector.broadcast %101 : vector<1x64xf32> to vector<8x64xf32>
    %104 = arith.mulf %103, %63 : vector<8x64xf32>
    %105 = math.exp %104 : vector<8x64xf32>
    %106 = arith.mulf %105, %94 : vector<8x64xf32>
    %107 = arith.mulf %101, %102 : vector<1x64xf32>
    %108 = vector.extract_strided_slice %44 {offsets = [0, 2], sizes = [8, 1], strides = [1, 1]} : vector<8x8xf32> to vector<8x1xf32>
    %109 = vector.broadcast %107 : vector<1x64xf32> to vector<8x64xf32>
    %110 = vector.broadcast %108 : vector<8x1xf32> to vector<8x64xf32>
    %111 = arith.mulf %109, %110 : vector<8x64xf32>
    %112 = arith.addf %106, %111 : vector<8x64xf32>
    %113 = vector.extract_strided_slice %46 {offsets = [0, 2], sizes = [8, 1], strides = [1, 1]} : vector<8x8xf32> to vector<8x1xf32>
    %114 = vector.broadcast %113 : vector<8x1xf32> to vector<8x64xf32>
    %115 = arith.mulf %112, %114 : vector<8x64xf32>
    %cst_55 = arith.constant dense<0.000000e+00> : vector<64xf32>
    %116 = vector.multi_reduction <add>, %115, %cst_55 [0] : vector<8x64xf32> to vector<64xf32>
    %117 = vector.shape_cast %116 : vector<64xf32> to vector<1x64xf32>
    %c2_56 = arith.constant 2 : index
    %c0_57 = arith.constant 0 : index
    %118 = vector.load %arg16[%c2_56, %c0_57] : memref<8x64xf32, #tpu.memory_space<vmem>>, vector<1x64xf32>
    tpu.vector_store %arg16[%c2_56, %c0_57], %117 {strides = array<i32>} : memref<8x64xf32, #tpu.memory_space<vmem>>, vector<1x64xf32>,
    %119 = vector.extract_strided_slice %62 {offsets = [3, 0], sizes = [1, 64], strides = [1, 1]} : vector<8x64xf32> to vector<1x64xf32>
    %120 = vector.extract_strided_slice %39 {offsets = [3, 0], sizes = [1, 64], strides = [1, 1]} : vector<8x64xf32> to vector<1x64xf32>
    %121 = vector.broadcast %119 : vector<1x64xf32> to vector<8x64xf32>
    %122 = arith.mulf %121, %63 : vector<8x64xf32>
    %123 = math.exp %122 : vector<8x64xf32>
    %124 = arith.mulf %123, %112 : vector<8x64xf32>
    %125 = arith.mulf %119, %120 : vector<1x64xf32>
    %126 = vector.extract_strided_slice %44 {offsets = [0, 3], sizes = [8, 1], strides = [1, 1]} : vector<8x8xf32> to vector<8x1xf32>
    %127 = vector.broadcast %125 : vector<1x64xf32> to vector<8x64xf32>
    %128 = vector.broadcast %126 : vector<8x1xf32> to vector<8x64xf32>
    %129 = arith.mulf %127, %128 : vector<8x64xf32>
    %130 = arith.addf %124, %129 : vector<8x64xf32>
    %131 = vector.extract_strided_slice %46 {offsets = [0, 3], sizes = [8, 1], strides = [1, 1]} : vector<8x8xf32> to vector<8x1xf32>
    %132 = vector.broadcast %131 : vector<8x1xf32> to vector<8x64xf32>
    %133 = arith.mulf %130, %132 : vector<8x64xf32>
    %cst_58 = arith.constant dense<0.000000e+00> : vector<64xf32>
    %134 = vector.multi_reduction <add>, %133, %cst_58 [0] : vector<8x64xf32> to vector<64xf32>
    %135 = vector.shape_cast %134 : vector<64xf32> to vector<1x64xf32>
    %c3_59 = arith.constant 3 : index
    %c0_60 = arith.constant 0 : index
    %136 = vector.load %arg16[%c3_59, %c0_60] : memref<8x64xf32, #tpu.memory_space<vmem>>, vector<1x64xf32>
    tpu.vector_store %arg16[%c3_59, %c0_60], %135 {strides = array<i32>} : memref<8x64xf32, #tpu.memory_space<vmem>>, vector<1x64xf32>,
    %137 = vector.extract_strided_slice %62 {offsets = [4, 0], sizes = [1, 64], strides = [1, 1]} : vector<8x64xf32> to vector<1x64xf32>
    %138 = vector.extract_strided_slice %39 {offsets = [4, 0], sizes = [1, 64], strides = [1, 1]} : vector<8x64xf32> to vector<1x64xf32>
    %139 = vector.broadcast %137 : vector<1x64xf32> to vector<8x64xf32>
    %140 = arith.mulf %139, %63 : vector<8x64xf32>
    %141 = math.exp %140 : vector<8x64xf32>
    %142 = arith.mulf %141, %130 : vector<8x64xf32>
    %143 = arith.mulf %137, %138 : vector<1x64xf32>
    %144 = vector.extract_strided_slice %44 {offsets = [0, 4], sizes = [8, 1], strides = [1, 1]} : vector<8x8xf32> to vector<8x1xf32>
    %145 = vector.broadcast %143 : vector<1x64xf32> to vector<8x64xf32>
    %146 = vector.broadcast %144 : vector<8x1xf32> to vector<8x64xf32>
    %147 = arith.mulf %145, %146 : vector<8x64xf32>
    %148 = arith.addf %142, %147 : vector<8x64xf32>
    %149 = vector.extract_strided_slice %46 {offsets = [0, 4], sizes = [8, 1], strides = [1, 1]} : vector<8x8xf32> to vector<8x1xf32>
    %150 = vector.broadcast %149 : vector<8x1xf32> to vector<8x64xf32>
    %151 = arith.mulf %148, %150 : vector<8x64xf32>
    %cst_61 = arith.constant dense<0.000000e+00> : vector<64xf32>
    %152 = vector.multi_reduction <add>, %151, %cst_61 [0] : vector<8x64xf32> to vector<64xf32>
    %153 = vector.shape_cast %152 : vector<64xf32> to vector<1x64xf32>
    %c4 = arith.constant 4 : index
    %c0_62 = arith.constant 0 : index
    %154 = vector.load %arg16[%c4, %c0_62] : memref<8x64xf32, #tpu.memory_space<vmem>>, vector<1x64xf32>
    tpu.vector_store %arg16[%c4, %c0_62], %153 {strides = array<i32>} : memref<8x64xf32, #tpu.memory_space<vmem>>, vector<1x64xf32>,
    %155 = vector.extract_strided_slice %62 {offsets = [5, 0], sizes = [1, 64], strides = [1, 1]} : vector<8x64xf32> to vector<1x64xf32>
    %156 = vector.extract_strided_slice %39 {offsets = [5, 0], sizes = [1, 64], strides = [1, 1]} : vector<8x64xf32> to vector<1x64xf32>
    %157 = vector.broadcast %155 : vector<1x64xf32> to vector<8x64xf32>
    %158 = arith.mulf %157, %63 : vector<8x64xf32>
    %159 = math.exp %158 : vector<8x64xf32>
    %160 = arith.mulf %159, %148 : vector<8x64xf32>
    %161 = arith.mulf %155, %156 : vector<1x64xf32>
    %162 = vector.extract_strided_slice %44 {offsets = [0, 5], sizes = [8, 1], strides = [1, 1]} : vector<8x8xf32> to vector<8x1xf32>
    %163 = vector.broadcast %161 : vector<1x64xf32> to vector<8x64xf32>
    %164 = vector.broadcast %162 : vector<8x1xf32> to vector<8x64xf32>
    %165 = arith.mulf %163, %164 : vector<8x64xf32>
    %166 = arith.addf %160, %165 : vector<8x64xf32>
    %167 = vector.extract_strided_slice %46 {offsets = [0, 5], sizes = [8, 1], strides = [1, 1]} : vector<8x8xf32> to vector<8x1xf32>
    %168 = vector.broadcast %167 : vector<8x1xf32> to vector<8x64xf32>
    %169 = arith.mulf %166, %168 : vector<8x64xf32>
    %cst_63 = arith.constant dense<0.000000e+00> : vector<64xf32>
    %170 = vector.multi_reduction <add>, %169, %cst_63 [0] : vector<8x64xf32> to vector<64xf32>
    %171 = vector.shape_cast %170 : vector<64xf32> to vector<1x64xf32>
    %c5 = arith.constant 5 : index
    %c0_64 = arith.constant 0 : index
    %172 = vector.load %arg16[%c5, %c0_64] : memref<8x64xf32, #tpu.memory_space<vmem>>, vector<1x64xf32>
    tpu.vector_store %arg16[%c5, %c0_64], %171 {strides = array<i32>} : memref<8x64xf32, #tpu.memory_space<vmem>>, vector<1x64xf32>,
    %173 = vector.extract_strided_slice %62 {offsets = [6, 0], sizes = [1, 64], strides = [1, 1]} : vector<8x64xf32> to vector<1x64xf32>
    %174 = vector.extract_strided_slice %39 {offsets = [6, 0], sizes = [1, 64], strides = [1, 1]} : vector<8x64xf32> to vector<1x64xf32>
    %175 = vector.broadcast %173 : vector<1x64xf32> to vector<8x64xf32>
    %176 = arith.mulf %175, %63 : vector<8x64xf32>
    %177 = math.exp %176 : vector<8x64xf32>
    %178 = arith.mulf %177, %166 : vector<8x64xf32>
    %179 = arith.mulf %173, %174 : vector<1x64xf32>
    %180 = vector.extract_strided_slice %44 {offsets = [0, 6], sizes = [8, 1], strides = [1, 1]} : vector<8x8xf32> to vector<8x1xf32>
    %181 = vector.broadcast %179 : vector<1x64xf32> to vector<8x64xf32>
    %182 = vector.broadcast %180 : vector<8x1xf32> to vector<8x64xf32>
    %183 = arith.mulf %181, %182 : vector<8x64xf32>
    %184 = arith.addf %178, %183 : vector<8x64xf32>
    %185 = vector.extract_strided_slice %46 {offsets = [0, 6], sizes = [8, 1], strides = [1, 1]} : vector<8x8xf32> to vector<8x1xf32>
    %186 = vector.broadcast %185 : vector<8x1xf32> to vector<8x64xf32>
    %187 = arith.mulf %184, %186 : vector<8x64xf32>
    %cst_65 = arith.constant dense<0.000000e+00> : vector<64xf32>
    %188 = vector.multi_reduction <add>, %187, %cst_65 [0] : vector<8x64xf32> to vector<64xf32>
    %189 = vector.shape_cast %188 : vector<64xf32> to vector<1x64xf32>
    %c6 = arith.constant 6 : index
    %c0_66 = arith.constant 0 : index
    %190 = vector.load %arg16[%c6, %c0_66] : memref<8x64xf32, #tpu.memory_space<vmem>>, vector<1x64xf32>
    tpu.vector_store %arg16[%c6, %c0_66], %189 {strides = array<i32>} : memref<8x64xf32, #tpu.memory_space<vmem>>, vector<1x64xf32>,
    %191 = vector.extract_strided_slice %62 {offsets = [7, 0], sizes = [1, 64], strides = [1, 1]} : vector<8x64xf32> to vector<1x64xf32>
    %192 = vector.extract_strided_slice %39 {offsets = [7, 0], sizes = [1, 64], strides = [1, 1]} : vector<8x64xf32> to vector<1x64xf32>
    %193 = vector.broadcast %191 : vector<1x64xf32> to vector<8x64xf32>
    %194 = arith.mulf %193, %63 : vector<8x64xf32>
    %195 = math.exp %194 : vector<8x64xf32>
    %196 = arith.mulf %195, %184 : vector<8x64xf32>
    %197 = arith.mulf %191, %192 : vector<1x64xf32>
    %198 = vector.extract_strided_slice %44 {offsets = [0, 7], sizes = [8, 1], strides = [1, 1]} : vector<8x8xf32> to vector<8x1xf32>
    %199 = vector.broadcast %197 : vector<1x64xf32> to vector<8x64xf32>
    %200 = vector.broadcast %198 : vector<8x1xf32> to vector<8x64xf32>
    %201 = arith.mulf %199, %200 : vector<8x64xf32>
    %202 = arith.addf %196, %201 : vector<8x64xf32>
    %203 = vector.extract_strided_slice %46 {offsets = [0, 7], sizes = [8, 1], strides = [1, 1]} : vector<8x8xf32> to vector<8x1xf32>
    %204 = vector.broadcast %203 : vector<8x1xf32> to vector<8x64xf32>
    %205 = arith.mulf %202, %204 : vector<8x64xf32>
    %cst_67 = arith.constant dense<0.000000e+00> : vector<64xf32>
    %206 = vector.multi_reduction <add>, %205, %cst_67 [0] : vector<8x64xf32> to vector<64xf32>
    %207 = vector.shape_cast %206 : vector<64xf32> to vector<1x64xf32>
    %c7 = arith.constant 7 : index
    %c0_68 = arith.constant 0 : index
    %208 = vector.load %arg16[%c7, %c0_68] : memref<8x64xf32, #tpu.memory_space<vmem>>, vector<1x64xf32>
    tpu.vector_store %arg16[%c7, %c0_68], %207 {strides = array<i32>} : memref<8x64xf32, #tpu.memory_space<vmem>>, vector<1x64xf32>,
    %c0_69 = arith.constant 0 : index
    %c0_70 = arith.constant 0 : index
    %209 = vector.load %arg16[%c0_69, %c0_70] : memref<8x64xf32, #tpu.memory_space<vmem>>, vector<8x64xf32>
    %c0_71 = arith.constant 0 : index
    %c0_72 = arith.constant 0 : index
    %210 = vector.load %arg12[%c0_71, %c0_72] : memref<1x64xf32, #tpu.memory_space<vmem>>, vector<1x64xf32>
    %211 = vector.broadcast %210 : vector<1x64xf32> to vector<8x64xf32>
    %212 = arith.mulf %39, %211 : vector<8x64xf32>
    %213 = arith.addf %209, %212 : vector<8x64xf32>
    %cst_73 = arith.constant 0.000000e+00 : f32
    %214 = vector.broadcast %cst_73 : f32 to vector<8x64xf32>
    %215 = arith.subf %214, %6 : vector<8x64xf32>
    %216 = math.exp %215 : vector<8x64xf32>
    %cst_74 = arith.constant 1.000000e+00 : f32
    %217 = vector.broadcast %cst_74 : f32 to vector<8x64xf32>
    %218 = arith.addf %217, %216 : vector<8x64xf32>
    %219 = tpu.reciprocal %218 {approx = true} : vector<8x64xf32> -> vector<8x64xf32>
    %220 = arith.mulf %6, %219 : vector<8x64xf32>
    %221 = arith.mulf %213, %220 : vector<8x64xf32>
    %222 = arith.truncf %221 : vector<8x64xf32> to vector<8x64xbf16>
    %c0_75 = arith.constant 0 : index
    %c0_76 = arith.constant 0 : index
    %223 = vector.load %arg13[%c0_75, %c0_76] : memref<64x32xbf16, #tpu.memory_space<vmem>>, vector<64x32xbf16>
    %cst_77 = arith.constant dense<0.000000e+00> : vector<8x32xf32>
    %224 = tpu.matmul %222, %223, %cst_77 {dimension_numbers = #tpu.dot_dimension_numbers<[1], [0], [0], [1], [0, 0, 1, 1], [], []>} : vector<8x64xbf16>, vector<64x32xbf16>, vector<8x32xf32> -> vector<8x32xf32>
    %c0_78 = arith.constant 0 : index
    %c0_79 = arith.constant 0 : index
    %c0_80 = arith.constant 0 : index
    %225 = vector.load %arg14[%c0_78, %c0_79, %c0_80] : memref<1x8x32xf32, #tpu.memory_space<vmem>>, vector<1x8x32xf32>
    %226 = vector.shape_cast %225 : vector<1x8x32xf32> to vector<8x32xf32>
    %227 = vector.shape_cast %224 : vector<8x32xf32> to vector<1x8x32xf32>
    tpu.vector_store %arg14[%c0_78, %c0_79, %c0_80], %227 {strides = array<i32>} : memref<1x8x32xf32, #tpu.memory_space<vmem>>, vector<1x8x32xf32>,
    return
  }
  func.func @transform_0(%arg0: i32) -> (i32, i32, i32) {
    %c0_i32 = arith.constant 0 : i32
    %c0_i32_0 = arith.constant 0 : i32
    %c0_i32_1 = arith.constant 0 : i32
    return %arg0, %c0_i32, %c0_i32_0 : i32, i32, i32
  }
  func.func @transform_1(%arg0: i32) -> (i32, i32) {
    %c0_i32 = arith.constant 0 : i32
    %c0_i32_0 = arith.constant 0 : i32
    %c0_i32_1 = arith.constant 0 : i32
    return %c0_i32, %c0_i32_0 : i32, i32
  }
  func.func @transform_2(%arg0: i32) -> (i32, i32) {
    %c0_i32 = arith.constant 0 : i32
    %c0_i32_0 = arith.constant 0 : i32
    %c0_i32_1 = arith.constant 0 : i32
    return %c0_i32, %c0_i32_0 : i32, i32
  }
  func.func @transform_3(%arg0: i32) -> (i32, i32) {
    %c0_i32 = arith.constant 0 : i32
    %c0_i32_0 = arith.constant 0 : i32
    %c0_i32_1 = arith.constant 0 : i32
    return %c0_i32, %c0_i32_0 : i32, i32
  }
  func.func @transform_4(%arg0: i32) -> (i32, i32) {
    %c0_i32 = arith.constant 0 : i32
    %c0_i32_0 = arith.constant 0 : i32
    %c0_i32_1 = arith.constant 0 : i32
    return %c0_i32, %c0_i32_0 : i32, i32
  }
  func.func @transform_5(%arg0: i32) -> (i32, i32) {
    %c0_i32 = arith.constant 0 : i32
    %c0_i32_0 = arith.constant 0 : i32
    %c0_i32_1 = arith.constant 0 : i32
    return %c0_i32, %c0_i32_0 : i32, i32
  }
  func.func @transform_6(%arg0: i32) -> (i32, i32) {
    %c0_i32 = arith.constant 0 : i32
    %c0_i32_0 = arith.constant 0 : i32
    %c0_i32_1 = arith.constant 0 : i32
    return %c0_i32, %c0_i32_0 : i32, i32
  }
  func.func @transform_7(%arg0: i32) -> (i32, i32) {
    %c0_i32 = arith.constant 0 : i32
    %c0_i32_0 = arith.constant 0 : i32
    %c0_i32_1 = arith.constant 0 : i32
    return %c0_i32, %c0_i32_0 : i32, i32
  }
  func.func @transform_8(%arg0: i32) -> (i32, i32) {
    %c0_i32 = arith.constant 0 : i32
    %c0_i32_0 = arith.constant 0 : i32
    %c0_i32_1 = arith.constant 0 : i32
    return %c0_i32, %c0_i32_0 : i32, i32
  }
  func.func @transform_9(%arg0: i32) -> (i32, i32) {
    %c0_i32 = arith.constant 0 : i32
    %c0_i32_0 = arith.constant 0 : i32
    %c0_i32_1 = arith.constant 0 : i32
    return %c0_i32, %c0_i32_0 : i32, i32
  }
  func.func @transform_10(%arg0: i32) -> (i32, i32) {
    %c0_i32 = arith.constant 0 : i32
    %c0_i32_0 = arith.constant 0 : i32
    %c0_i32_1 = arith.constant 0 : i32
    return %c0_i32, %c0_i32_0 : i32, i32
  }
  func.func @transform_11(%arg0: i32) -> (i32, i32) {
    %c0_i32 = arith.constant 0 : i32
    %c0_i32_0 = arith.constant 0 : i32
    %c0_i32_1 = arith.constant 0 : i32
    return %c0_i32, %c0_i32_0 : i32, i32
  }
  func.func @transform_12(%arg0: i32) -> (i32, i32) {
    %c0_i32 = arith.constant 0 : i32
    %c0_i32_0 = arith.constant 0 : i32
    %c0_i32_1 = arith.constant 0 : i32
    return %c0_i32, %c0_i32_0 : i32, i32
  }
  func.func @transform_13(%arg0: i32) -> (i32, i32, i32) {
    %c0_i32 = arith.constant 0 : i32
    %c0_i32_0 = arith.constant 0 : i32
    %c0_i32_1 = arith.constant 0 : i32
    return %arg0, %c0_i32, %c0_i32_0 : i32, i32, i32
  }
}

module attributes {stable_mosaic.version = 11 : i64} {
  func.func @_attn_pool_norm_kernel(%arg0: i32, %arg1: memref<1x8x32xf32, #tpu.memory_space<vmem>>, %arg2: memref<4x32x24xbf16, #tpu.memory_space<vmem>>, %arg3: memref<4x1x24xf32, #tpu.memory_space<vmem>>, %arg4: memref<32x32xbf16, #tpu.memory_space<vmem>>, %arg5: memref<1x32xf32, #tpu.memory_space<vmem>>, %arg6: memref<1x32xf32, #tpu.memory_space<vmem>>, %arg7: memref<1x32xf32, #tpu.memory_space<vmem>>, %arg8: memref<1x1x32xf32, #tpu.memory_space<vmem>>, %arg9: memref<8x32xf32, #tpu.memory_space<vmem>>) attributes {dimension_semantics = [#tpu.dimension_semantics<parallel>], iteration_bounds = array<i64: 2>, scalar_prefetch = 0 : i64, scratch_operands = 1 : i64, tpu.core_type = #tpu.core_type<tc>, window_params = [{transform_indices = @transform_0, window_bounds = array<i64: 1, 8, 32>}, {pipeline_mode = #tpu.pipeline_mode<synchronous>, transform_indices = @transform_1, window_bounds = array<i64: 4, 32, 24>}, {pipeline_mode = #tpu.pipeline_mode<synchronous>, transform_indices = @transform_2, window_bounds = array<i64: 4, 1, 24>}, {pipeline_mode = #tpu.pipeline_mode<synchronous>, transform_indices = @transform_3, window_bounds = array<i64: 32, 32>}, {pipeline_mode = #tpu.pipeline_mode<synchronous>, transform_indices = @transform_4, window_bounds = array<i64: 1, 32>}, {pipeline_mode = #tpu.pipeline_mode<synchronous>, transform_indices = @transform_5, window_bounds = array<i64: 1, 32>}, {pipeline_mode = #tpu.pipeline_mode<synchronous>, transform_indices = @transform_6, window_bounds = array<i64: 1, 32>}, {transform_indices = @transform_7, window_bounds = array<i64: 1, 1, 32>}]} {
    %c0 = arith.constant 0 : index
    %c0_0 = arith.constant 0 : index
    %c0_1 = arith.constant 0 : index
    %0 = vector.load %arg1[%c0, %c0_0, %c0_1] : memref<1x8x32xf32, #tpu.memory_space<vmem>>, vector<1x8x32xf32>
    %1 = vector.shape_cast %0 : vector<1x8x32xf32> to vector<8x32xf32>
    %2 = arith.truncf %1 : vector<8x32xf32> to vector<8x32xbf16>
    %3 = vector.shape_cast %2 : vector<8x32xbf16> to vector<1x8x32xbf16>
    %4 = vector.shape_cast %3 : vector<1x8x32xbf16> to vector<1x8x32xbf16>
    %5 = vector.broadcast %4 : vector<1x8x32xbf16> to vector<4x8x32xbf16>
    %c0_2 = arith.constant 0 : index
    %c0_3 = arith.constant 0 : index
    %c0_4 = arith.constant 0 : index
    %6 = vector.load %arg2[%c0_2, %c0_3, %c0_4] : memref<4x32x24xbf16, #tpu.memory_space<vmem>>, vector<4x32x24xbf16>
    "tpu.trace_start"() <{level = 10 : i32, message = "hvd,hdf->hvf"}> : () -> ()
    %cst = arith.constant dense<0.000000e+00> : vector<4x8x24xf32>
    %7 = tpu.matmul %5, %6, %cst {dimension_numbers = #tpu.dot_dimension_numbers<[2], [1], [1], [2], [0, 0, 0, 1, 1, 2], [0], [0]>} : vector<4x8x32xbf16>, vector<4x32x24xbf16>, vector<4x8x24xf32> -> vector<4x8x24xf32>
    "tpu.trace_stop"() : () -> ()
    %c0_5 = arith.constant 0 : index
    %c0_6 = arith.constant 0 : index
    %c0_7 = arith.constant 0 : index
    %8 = vector.load %arg3[%c0_5, %c0_6, %c0_7] : memref<4x1x24xf32, #tpu.memory_space<vmem>>, vector<4x1x24xf32>
    %9 = vector.broadcast %8 : vector<4x1x24xf32> to vector<4x8x24xf32>
    %10 = arith.addf %7, %9 : vector<4x8x24xf32>
    %11 = vector.extract_strided_slice %10 {offsets = [0, 0, 0], sizes = [4, 8, 8], strides = [1, 1, 1]} : vector<4x8x24xf32> to vector<4x8x8xf32>
    %cst_8 = arith.constant 0.353553385 : f32
    %12 = vector.broadcast %cst_8 : f32 to vector<4x8x8xf32>
    %13 = arith.mulf %11, %12 : vector<4x8x8xf32>
    %14 = arith.truncf %13 : vector<4x8x8xf32> to vector<4x8x8xbf16>
    %15 = vector.extract_strided_slice %10 {offsets = [0, 0, 8], sizes = [4, 8, 8], strides = [1, 1, 1]} : vector<4x8x24xf32> to vector<4x8x8xf32>
    %16 = arith.truncf %15 : vector<4x8x8xf32> to vector<4x8x8xbf16>
    %17 = vector.extract_strided_slice %10 {offsets = [0, 0, 16], sizes = [4, 8, 8], strides = [1, 1, 1]} : vector<4x8x24xf32> to vector<4x8x8xf32>
    %18 = arith.truncf %17 : vector<4x8x8xf32> to vector<4x8x8xbf16>
    "tpu.trace_start"() <{level = 10 : i32, message = "hqe,hke->hqk"}> : () -> ()
    %cst_9 = arith.constant dense<0.000000e+00> : vector<4x8x8xf32>
    %19 = tpu.matmul %14, %16, %cst_9 {dimension_numbers = #tpu.dot_dimension_numbers<[2], [2], [1], [1], [0, 0, 0, 1, 1, 1], [0], [0]>} : vector<4x8x8xbf16>, vector<4x8x8xbf16>, vector<4x8x8xf32> -> vector<4x8x8xf32>
    "tpu.trace_stop"() : () -> ()
    %cst_10 = arith.constant dense<0xFF800000> : vector<4x8xf32>
    %20 = vector.multi_reduction <maximumf>, %19, %cst_10 [2] : vector<4x8x8xf32> to vector<4x8xf32>
    %21 = vector.shape_cast %20 : vector<4x8xf32> to vector<4x8x1xf32>
    %22 = vector.broadcast %21 : vector<4x8x1xf32> to vector<4x8x8xf32>
    %23 = arith.subf %19, %22 : vector<4x8x8xf32>
    %24 = math.exp %23 : vector<4x8x8xf32>
    %cst_11 = arith.constant dense<0.000000e+00> : vector<4x8xf32>
    %25 = vector.multi_reduction <add>, %24, %cst_11 [2] : vector<4x8x8xf32> to vector<4x8xf32>
    %26 = vector.shape_cast %25 : vector<4x8xf32> to vector<4x8x1xf32>
    %27 = tpu.reciprocal %26 {approx = true} : vector<4x8x1xf32> -> vector<4x8x1xf32>
    %28 = vector.broadcast %27 : vector<4x8x1xf32> to vector<4x8x8xf32>
    %29 = arith.mulf %24, %28 : vector<4x8x8xf32>
    %30 = arith.truncf %29 : vector<4x8x8xf32> to vector<4x8x8xbf16>
    "tpu.trace_start"() <{level = 10 : i32, message = "hqk,hke->hqe"}> : () -> ()
    %cst_12 = arith.constant dense<0.000000e+00> : vector<4x8x8xf32>
    %31 = tpu.matmul %30, %18, %cst_12 {dimension_numbers = #tpu.dot_dimension_numbers<[2], [1], [1], [2], [0, 0, 0, 1, 1, 2], [0], [0]>} : vector<4x8x8xbf16>, vector<4x8x8xbf16>, vector<4x8x8xf32> -> vector<4x8x8xf32>
    "tpu.trace_stop"() : () -> ()
    %32 = vector.extract_strided_slice %31 {offsets = [0, 0, 0], sizes = [1, 8, 8], strides = [1, 1, 1]} : vector<4x8x8xf32> to vector<1x8x8xf32>
    %33 = vector.shape_cast %32 : vector<1x8x8xf32> to vector<8x8xf32>
    %c0_13 = arith.constant 0 : index
    %c0_14 = arith.constant 0 : index
    %34 = vector.load %arg9[%c0_13, %c0_14] : memref<8x32xf32, #tpu.memory_space<vmem>>, vector<8x8xf32>
    tpu.vector_store %arg9[%c0_13, %c0_14], %33 {strides = array<i32>} : memref<8x32xf32, #tpu.memory_space<vmem>>, vector<8x8xf32>,
    %35 = vector.extract_strided_slice %31 {offsets = [1, 0, 0], sizes = [1, 8, 8], strides = [1, 1, 1]} : vector<4x8x8xf32> to vector<1x8x8xf32>
    %36 = vector.shape_cast %35 : vector<1x8x8xf32> to vector<8x8xf32>
    %c0_15 = arith.constant 0 : index
    %c8 = arith.constant 8 : index
    %37 = vector.load %arg9[%c0_15, %c8] : memref<8x32xf32, #tpu.memory_space<vmem>>, vector<8x8xf32>
    tpu.vector_store %arg9[%c0_15, %c8], %36 {strides = array<i32>} : memref<8x32xf32, #tpu.memory_space<vmem>>, vector<8x8xf32>,
    %38 = vector.extract_strided_slice %31 {offsets = [2, 0, 0], sizes = [1, 8, 8], strides = [1, 1, 1]} : vector<4x8x8xf32> to vector<1x8x8xf32>
    %39 = vector.shape_cast %38 : vector<1x8x8xf32> to vector<8x8xf32>
    %c0_16 = arith.constant 0 : index
    %c16 = arith.constant 16 : index
    %40 = vector.load %arg9[%c0_16, %c16] : memref<8x32xf32, #tpu.memory_space<vmem>>, vector<8x8xf32>
    tpu.vector_store %arg9[%c0_16, %c16], %39 {strides = array<i32>} : memref<8x32xf32, #tpu.memory_space<vmem>>, vector<8x8xf32>,
    %41 = vector.extract_strided_slice %31 {offsets = [3, 0, 0], sizes = [1, 8, 8], strides = [1, 1, 1]} : vector<4x8x8xf32> to vector<1x8x8xf32>
    %42 = vector.shape_cast %41 : vector<1x8x8xf32> to vector<8x8xf32>
    %c0_17 = arith.constant 0 : index
    %c24 = arith.constant 24 : index
    %43 = vector.load %arg9[%c0_17, %c24] : memref<8x32xf32, #tpu.memory_space<vmem>>, vector<8x8xf32>
    tpu.vector_store %arg9[%c0_17, %c24], %42 {strides = array<i32>} : memref<8x32xf32, #tpu.memory_space<vmem>>, vector<8x8xf32>,
    %c0_18 = arith.constant 0 : index
    %c0_19 = arith.constant 0 : index
    %44 = vector.load %arg9[%c0_18, %c0_19] : memref<8x32xf32, #tpu.memory_space<vmem>>, vector<8x32xf32>
    %45 = arith.truncf %44 : vector<8x32xf32> to vector<8x32xbf16>
    %c0_20 = arith.constant 0 : index
    %c0_21 = arith.constant 0 : index
    %46 = vector.load %arg4[%c0_20, %c0_21] : memref<32x32xbf16, #tpu.memory_space<vmem>>, vector<32x32xbf16>
    %cst_22 = arith.constant dense<0.000000e+00> : vector<8x32xf32>
    %47 = tpu.matmul %45, %46, %cst_22 {dimension_numbers = #tpu.dot_dimension_numbers<[1], [0], [0], [1], [0, 0, 1, 1], [], []>} : vector<8x32xbf16>, vector<32x32xbf16>, vector<8x32xf32> -> vector<8x32xf32>
    %c0_23 = arith.constant 0 : index
    %c0_24 = arith.constant 0 : index
    %48 = vector.load %arg5[%c0_23, %c0_24] : memref<1x32xf32, #tpu.memory_space<vmem>>, vector<1x32xf32>
    %49 = vector.broadcast %48 : vector<1x32xf32> to vector<8x32xf32>
    %50 = arith.addf %47, %49 : vector<8x32xf32>
    %cst_25 = arith.constant dense<0.000000e+00> : vector<32xf32>
    %51 = vector.multi_reduction <add>, %50, %cst_25 [0] : vector<8x32xf32> to vector<32xf32>
    %52 = vector.shape_cast %51 : vector<32xf32> to vector<1x32xf32>
    %cst_26 = arith.constant 8.000000e+00 : f32
    %53 = vector.broadcast %cst_26 : f32 to vector<1x32xf32>
    %54 = arith.divf %52, %53 : vector<1x32xf32>
    %c0_27 = arith.constant 0 : index
    %c0_28 = arith.constant 0 : index
    %55 = vector.load %arg6[%c0_27, %c0_28] : memref<1x32xf32, #tpu.memory_space<vmem>>, vector<1x32xf32>
    %c0_29 = arith.constant 0 : index
    %c0_30 = arith.constant 0 : index
    %56 = vector.load %arg7[%c0_29, %c0_30] : memref<1x32xf32, #tpu.memory_space<vmem>>, vector<1x32xf32>
    %cst_31 = arith.constant dense<0.000000e+00> : vector<1xf32>
    %57 = vector.multi_reduction <add>, %54, %cst_31 [1] : vector<1x32xf32> to vector<1xf32>
    %58 = vector.shape_cast %57 : vector<1xf32> to vector<1x1xf32>
    %cst_32 = arith.constant 3.200000e+01 : f32
    %59 = vector.broadcast %cst_32 : f32 to vector<1x1xf32>
    %60 = arith.divf %58, %59 : vector<1x1xf32>
    %61 = vector.broadcast %60 : vector<1x1xf32> to vector<1x32xf32>
    %62 = arith.subf %54, %61 : vector<1x32xf32>
    %63 = arith.mulf %62, %62 : vector<1x32xf32>
    %cst_33 = arith.constant dense<0.000000e+00> : vector<1xf32>
    %64 = vector.multi_reduction <add>, %63, %cst_33 [1] : vector<1x32xf32> to vector<1xf32>
    %65 = vector.shape_cast %64 : vector<1xf32> to vector<1x1xf32>
    %cst_34 = arith.constant 3.200000e+01 : f32
    %66 = vector.broadcast %cst_34 : f32 to vector<1x1xf32>
    %67 = arith.divf %65, %66 : vector<1x1xf32>
    %68 = vector.broadcast %60 : vector<1x1xf32> to vector<1x32xf32>
    %69 = arith.subf %54, %68 : vector<1x32xf32>
    %cst_35 = arith.constant 9.99999974E-6 : f32
    %70 = vector.broadcast %cst_35 : f32 to vector<1x1xf32>
    %71 = arith.addf %67, %70 : vector<1x1xf32>
    %72 = math.rsqrt %71 : vector<1x1xf32>
    %73 = vector.broadcast %72 : vector<1x1xf32> to vector<1x32xf32>
    %74 = arith.mulf %69, %73 : vector<1x32xf32>
    %75 = arith.mulf %74, %55 : vector<1x32xf32>
    %76 = arith.addf %75, %56 : vector<1x32xf32>
    %c0_36 = arith.constant 0 : index
    %c0_37 = arith.constant 0 : index
    %c0_38 = arith.constant 0 : index
    %77 = vector.load %arg8[%c0_36, %c0_37, %c0_38] : memref<1x1x32xf32, #tpu.memory_space<vmem>>, vector<1x1x32xf32>
    %78 = vector.shape_cast %77 : vector<1x1x32xf32> to vector<1x32xf32>
    %79 = vector.shape_cast %76 : vector<1x32xf32> to vector<1x1x32xf32>
    tpu.vector_store %arg8[%c0_36, %c0_37, %c0_38], %79 {strides = array<i32>} : memref<1x1x32xf32, #tpu.memory_space<vmem>>, vector<1x1x32xf32>,
    return
  }
  func.func @transform_0(%arg0: i32) -> (i32, i32, i32) {
    %c0_i32 = arith.constant 0 : i32
    %c0_i32_0 = arith.constant 0 : i32
    %c0_i32_1 = arith.constant 0 : i32
    return %arg0, %c0_i32, %c0_i32_0 : i32, i32, i32
  }
  func.func @transform_1(%arg0: i32) -> (i32, i32, i32) {
    %c0_i32 = arith.constant 0 : i32
    %c0_i32_0 = arith.constant 0 : i32
    %c0_i32_1 = arith.constant 0 : i32
    %c0_i32_2 = arith.constant 0 : i32
    return %c0_i32, %c0_i32_0, %c0_i32_1 : i32, i32, i32
  }
  func.func @transform_2(%arg0: i32) -> (i32, i32, i32) {
    %c0_i32 = arith.constant 0 : i32
    %c0_i32_0 = arith.constant 0 : i32
    %c0_i32_1 = arith.constant 0 : i32
    %c0_i32_2 = arith.constant 0 : i32
    return %c0_i32, %c0_i32_0, %c0_i32_1 : i32, i32, i32
  }
  func.func @transform_3(%arg0: i32) -> (i32, i32) {
    %c0_i32 = arith.constant 0 : i32
    %c0_i32_0 = arith.constant 0 : i32
    %c0_i32_1 = arith.constant 0 : i32
    return %c0_i32, %c0_i32_0 : i32, i32
  }
  func.func @transform_4(%arg0: i32) -> (i32, i32) {
    %c0_i32 = arith.constant 0 : i32
    %c0_i32_0 = arith.constant 0 : i32
    %c0_i32_1 = arith.constant 0 : i32
    return %c0_i32, %c0_i32_0 : i32, i32
  }
  func.func @transform_5(%arg0: i32) -> (i32, i32) {
    %c0_i32 = arith.constant 0 : i32
    %c0_i32_0 = arith.constant 0 : i32
    %c0_i32_1 = arith.constant 0 : i32
    return %c0_i32, %c0_i32_0 : i32, i32
  }
  func.func @transform_6(%arg0: i32) -> (i32, i32) {
    %c0_i32 = arith.constant 0 : i32
    %c0_i32_0 = arith.constant 0 : i32
    %c0_i32_1 = arith.constant 0 : i32
    return %c0_i32, %c0_i32_0 : i32, i32
  }
  func.func @transform_7(%arg0: i32) -> (i32, i32, i32) {
    %c0_i32 = arith.constant 0 : i32
    %c0_i32_0 = arith.constant 0 : i32
    %c0_i32_1 = arith.constant 0 : i32
    return %arg0, %c0_i32, %c0_i32_0 : i32, i32, i32
  }
}

</mosaic_0001>

<bundles_post_ra>
// kernel: view_mamba_aggregate2.6
= control target key start
LH: loop header
LB: loop body
LE: loop exit
PB: predicated region body
PF: predicated region fallthrough
CT: control target
= control target key end

     0   :  { %v183_v0 = vmov 0.0   ;;  %vm184_vm0 = vmmov 0   ;;  %vm47_vm1 = vcmask 261120   ;;  %s249_s1 = inlined_call_operand.vmem [shape: bf16[32,32], index: 1, kind: input, shape index: {}]   ;;  %s250_s0 = inlined_call_operand.vmem [shape: f32[16,32], index: 0, kind: input, shape index: {}]   ;;  %s251_s2 = inlined_call_operand.vmem [shape: f32[1,32], index: 2, kind: input, shape index: {}]   ;;  %s252_s3 = inlined_call_operand.vmem [shape: f32[1,32], index: 3, kind: input, shape index: {}]   ;;  %s253_s4 = inlined_call_operand.vmem [shape: f32[1,32], index: 4, kind: input, shape index: {}]   ;;  %s254_s5 = inlined_call_operand.vmem [shape: f32[16,32], index: 5, kind: output, shape index: {}]  }
   0x1   :  { %163 = vmatprep.subr.bf16.mxu0 %v183_v0  ;;  %v173_v1 = vld [vmem:[%s249_s1] sm:$0xff]   ;;  %167 = vmatprep.mubr.msk.bf16.mxu0 %vm184_vm0, %v183_v0  ;;  %v174_v2 = vld [vmem:[%s249_s1 + $0x8] sm:$0xff]  }
   0x2   :  { %164 = vmatpush3.bf16.msra.mxu0 %v173_v1  ;;  %v21_v3 = vld [vmem:[%s250_s0] sm:$0xff]  ;;  %v22_v4 = vld [vmem:[%s250_s0 + $0x8] sm:$0xff] }
   0x3   :  { %165 = vmatprep.subr.bf16.mxu0 %v183_v0  ;;  %v23_v5 = vpack.c.bf16 %v22_v4, %v21_v3  ;;  %v154_v6 = vld [vmem:[%s251_s2] ss:$0 sm:$0xff] }
   0x4   :  { %v158_v42 = vld [vmem:[%s252_s3] ss:$0 sm:$0xff] }
   0x5   :  { %v159_v44 = vld [vmem:[%s253_s4] ss:$0 sm:$0xff] }
   0x6   :  { %166 = vmatpush3.bf16.msra.mxu0 %v174_v2 }
   0x9   :  { %168 = vmatmul.mubr.msk.bf16.vlgmr.msra.gmra.mrb[0].mxu0 %vm47_vm1, %v23_v5 }
  0xdc   :  { %v85_v7 = vpop.f32.mrb[0].mxu0 }
  0xdd   :  { %v86_v8 = vadd.f32 %v154_v6, %v85_v7  ;;  %v169_v9 = vpop.f32.mrb[1].mxu0 }
  0xde   :  { %v88_v10 = vpop.f32.mrb[2].mxu0 }
  0xdf   :  { %v95_v11 = vmul.f32 0.70710677, %v86_v8  ;;  %v89_v12 = vadd.f32 %v154_v6, %v88_v10  ;;  %v170_v13 = vpop.f32.mrb[3].mxu0  ;;  %v92_v16 = vmul.f32 0.5, %v86_v8 }
  0xe1   :  { %175 = verf.f32 %v95_v11  ;;  %v96_v14 = vmul.f32 0.70710677, %v89_v12  ;;  %v93_v19 = vmul.f32 0.5, %v89_v12 }
  0xe3   :  { %177 = verf.f32 %v96_v14 }
  0xeb   :  { %v176_v15 = vpop.eup %175 }
  0xec   :  { %v99_v17 = vadd.f32 1.0, %v176_v15 }
  0xed   :  { %v178_v18 = vpop.eup %177 }
  0xee   :  { %v101_v20 = vmul.f32 %v99_v17, %v92_v16  ;;  %v100_v21 = vadd.f32 1.0, %v178_v18 }
  0xf0   :  { %v105_v22 = vsel %vm47_vm1, %v101_v20, 0.0  ;;  %v102_v23 = vmul.f32 %v100_v21, %v93_v19 }
  0xf1   :  { %106 = vadd.xlane.f32.xlu0 %v105_v22 }
  0xf2   :  { %v108_v24 = vsel %vm47_vm1, %v102_v23, 0.0 }
  0xf5   :  { %109 = vadd.xlane.f32.xlu0 %v108_v24 }
 0x17e   :  { %v107_v25 = vpop.xlane.xlu0 %106 }
 0x17f   :  { %v112_v26 = vmul.f32 0.03125, %v107_v25 }
 0x181   :  { %v114_v27 = vsub.f32 %v101_v20, %v112_v26 }
 0x182   :  { %v110_v28 = vpop.xlane.xlu0 %109 }
 0x183   :  { %v113_v29 = vmul.f32 0.03125, %v110_v28  ;;  %v116_v30 = vmul.f32 %v114_v27, %v114_v27 }
 0x185   :  { %v115_v31 = vsub.f32 %v102_v23, %v113_v29  ;;  %v118_v32 = vsel %vm47_vm1, %v116_v30, 0.0 }
 0x186   :  { %119 = vadd.xlane.f32.xlu1 %v118_v32 }
 0x187   :  { %v117_v33 = vmul.f32 %v115_v31, %v115_v31 }
 0x189   :  { %v121_v34 = vsel %vm47_vm1, %v117_v33, 0.0 }
 0x18a   :  { %122 = vadd.xlane.f32.xlu1 %v121_v34 }
 0x213   :  { %v120_v35 = vpop.xlane.xlu1 %119 }
 0x214   :  { %v124_v36 = vmul.f32 0.03125, %v120_v35 }
 0x216   :  { %v126_v37 = vadd.f32 1e-05, %v124_v36 }
 0x217   :  { %v123_v38 = vpop.xlane.xlu1 %122 }
 0x218   :  { %179 = vrsqrt.f32 %v126_v37  ;;  %v125_v39 = vmul.f32 0.03125, %v123_v38 }
 0x21a   :  { %v127_v40 = vadd.f32 1e-05, %v125_v39 }
 0x21c   :  { %181 = vrsqrt.f32 %v127_v40 }
 0x222   :  { %v180_v41 = vpop.eup %179 }
 0x223   :  { %v130_v43 = vmul.f32 %v180_v41, %v114_v27 }
 0x225   :  { %v138_v45 = vmul.f32 %v158_v42, %v130_v43 }
 0x226   :  { %v182_v46 = vpop.eup %181 }
 0x227   :  { %v146_v47 = vadd.f32 %v159_v44, %v138_v45  ;;  %v131_v48 = vmul.f32 %v182_v46, %v115_v31 }
 0x229   :  { %148 = vst.msk [vmem:[%s254_s5] sm:$0xff] %vm47_vm1, %v146_v47  ;;  %v139_v49 = vmul.f32 %v158_v42, %v131_v48 }
 0x22b   :  { %v147_v50 = vadd.f32 %v159_v44, %v139_v49 }
 0x22d   :  { %149 = vst.msk [vmem:[%s254_s5 + $0x8] sm:$0xff] %vm47_vm1, %v147_v50 }

// kernel: view_mamba_aggregate2.4
= control target key start
LH: loop header
LB: loop body
LE: loop exit
PB: predicated region body
PF: predicated region fallthrough
CT: control target
= control target key end

     0   :  { %vm79_vm0 = vcmask 1043456   ;;  %vm325_vm1 = vcmask 1041408   ;;  %vm406_vm2 = vmmov 0   ;;  %vm299_vm3 = vcmask 1041409   ;;  %s549_s0 = inlined_call_operand.vmem [shape: f32[16,4,256], index: 0, kind: input, shape index: {}]   ;;  %s550_s1 = inlined_call_operand.vmem [shape: bf16[4,32], index: 1, kind: input, shape index: {}]   ;;  %s551_s2 = inlined_call_operand.vmem [shape: f32[1,32], index: 2, kind: input, shape index: {}]   ;;  %s552_s3 = inlined_call_operand.vmem [shape: f32[16,32], index: 3, kind: output, shape index: {}]  }
   0x1   :  { %v23_v0 = vld [vmem:[%s549_s0 + $0x40] sm:$0xff]  ;;  %v24_v2 = vld [vmem:[%s549_s0 + $0x48] sm:$0xff]  ;;  %v25_v8 = vld [vmem:[%s549_s0 + $0x50] sm:$0xff]  ;;  %vm301_vm4 = vcmask 1042434   ;;  %vm303_vm5 = vcmask 1043459   ;;  %vm305_vm6 = vcmask 1044484  }
   0x2   :  { %v15_v1 = vld [vmem:[%s549_s0] sm:$0xff]  ;;  %v55_v3 = vcombine.high %v23_v0, %v23_v0  ;;  %v120_v4 = vsel %vm79_vm0, %v23_v0, 0.0  ;;  %v16_v7 = vld [vmem:[%s549_s0 + $0x8] sm:$0xff]  ;;  %v56_v9 = vcombine.high %v24_v2, %v24_v2  ;;  %v125_v10 = vsel %vm79_vm0, %v24_v2, 0.0  ;;  %v17_v12 = vld [vmem:[%s549_s0 + $0x10] sm:$0xff] }
   0x3   :  { %v47_v5 = vcombine.high %v15_v1, %v15_v1  ;;  %v80_v6 = vsel %vm79_vm0, %v15_v1, 0.0  ;;  %v48_v11 = vcombine.high %v16_v7, %v16_v7  ;;  %v85_v15 = vsel %vm79_vm0, %v16_v7, 0.0  ;;  %v26_v21 = vld [vmem:[%s549_s0 + $0x58] sm:$0xff]  ;;  %v27_v32 = vld [vmem:[%s549_s0 + $0x60] sm:$0xff]  ;;  %v28_v42 = vld [vmem:[%s549_s0 + $0x68] sm:$0xff] }
   0x4   :  { %v121_v13 = vsel %vm79_vm0, %v55_v3, 0.0  ;;  %v57_v16 = vcombine.high %v25_v8, %v25_v8  ;;  %v126_v19 = vsel %vm79_vm0, %v56_v9, 0.0  ;;  %v18_v22 = vld [vmem:[%s549_s0 + $0x18] sm:$0xff]  ;;  %v49_v23 = vcombine.high %v17_v12, %v17_v12  ;;  %v19_v33 = vld [vmem:[%s549_s0 + $0x20] sm:$0xff]  ;;  %v20_v43 = vld [vmem:[%s549_s0 + $0x28] sm:$0xff] }
   0x5   :  { %v81_v14 = vsel %vm79_vm0, %v47_v5, 0.0  ;;  %v122_v17 = vadd.f32 %v121_v13, %v120_v4  ;;  %v86_v20 = vsel %vm79_vm0, %v48_v11, 0.0  ;;  %v127_v24 = vadd.f32 %v126_v19, %v125_v10  ;;  %v29_v52 = vld [vmem:[%s549_s0 + $0x70] sm:$0xff]  ;;  %v30_v62 = vld [vmem:[%s549_s0 + $0x78] sm:$0xff] }
   0x6   :  { %v82_v18 = vadd.f32 %v81_v14, %v80_v6  ;;  %v87_v25 = vadd.f32 %v86_v20, %v85_v15  ;;  %v130_v26 = vsel %vm79_vm0, %v25_v8, 0.0  ;;  %v131_v27 = vsel %vm79_vm0, %v57_v16, 0.0  ;;  %v21_v53 = vld [vmem:[%s549_s0 + $0x30] sm:$0xff]  ;;  %v22_v63 = vld [vmem:[%s549_s0 + $0x38] sm:$0xff]  ;;  %v193_v16 = vld [vmem:[%s550_s1] sm:$0x3] }
   0x7   :  { %123 = vadd.xlane.f32.xlu1 %v122_v17  ;;  %v90_v28 = vsel %vm79_vm0, %v17_v12, 0.0  ;;  %v91_v29 = vsel %vm79_vm0, %v49_v23, 0.0  ;;  %v58_v30 = vcombine.high %v26_v21, %v26_v21  ;;  %v50_v31 = vcombine.high %v18_v22, %v18_v22 }
   0x8   :  { %83 = vadd.xlane.f32.xlu0 %v82_v18  ;;  %v132_v34 = vadd.f32 %v131_v27, %v130_v26  ;;  %v92_v35 = vadd.f32 %v91_v29, %v90_v28  ;;  %v135_v36 = vsel %vm79_vm0, %v26_v21, 0.0  ;;  %v59_v37 = vcombine.high %v27_v32, %v27_v32 }
   0x9   :  { %v136_v38 = vsel %vm79_vm0, %v58_v30, 0.0  ;;  %v95_v39 = vsel %vm79_vm0, %v18_v22, 0.0  ;;  %v96_v40 = vsel %vm79_vm0, %v50_v31, 0.0  ;;  %v51_v41 = vcombine.high %v19_v33, %v19_v33 }
   0xa   :  { %v137_v44 = vadd.f32 %v136_v38, %v135_v36  ;;  %v97_v45 = vadd.f32 %v96_v40, %v95_v39  ;;  %v140_v46 = vsel %vm79_vm0, %v27_v32, 0.0  ;;  %v141_v47 = vsel %vm79_vm0, %v59_v37, 0.0 }
   0xb   :  { %128 = vadd.xlane.f32.xlu1 %v127_v24  ;;  %v100_v48 = vsel %vm79_vm0, %v19_v33, 0.0  ;;  %v101_v49 = vsel %vm79_vm0, %v51_v41, 0.0  ;;  %v60_v50 = vcombine.high %v28_v42, %v28_v42  ;;  %v52_v51 = vcombine.high %v20_v43, %v20_v43 }
   0xc   :  { %88 = vadd.xlane.f32.xlu0 %v87_v25  ;;  %v142_v54 = vadd.f32 %v141_v47, %v140_v46  ;;  %v102_v55 = vadd.f32 %v101_v49, %v100_v48  ;;  %v145_v56 = vsel %vm79_vm0, %v28_v42, 0.0  ;;  %v105_v57 = vsel %vm79_vm0, %v20_v43, 0.0 }
   0xd   :  { %v146_v58 = vsel %vm79_vm0, %v60_v50, 0.0  ;;  %v106_v59 = vsel %vm79_vm0, %v52_v51, 0.0  ;;  %v61_v60 = vcombine.high %v29_v52, %v29_v52  ;;  %v53_v61 = vcombine.high %v21_v53, %v21_v53 }
   0xe   :  { %v147_v0 = vadd.f32 %v146_v58, %v145_v56  ;;  %v107_v1 = vadd.f32 %v106_v59, %v105_v57  ;;  %v150_v2 = vsel %vm79_vm0, %v29_v52, 0.0  ;;  %v110_v3 = vsel %vm79_vm0, %v21_v53, 0.0 }
   0xf   :  { %133 = vadd.xlane.f32.xlu1 %v132_v34  ;;  %v151_v4 = vsel %vm79_vm0, %v61_v60, 0.0  ;;  %v111_v5 = vsel %vm79_vm0, %v53_v61, 0.0  ;;  %v62_v6 = vcombine.high %v30_v62, %v30_v62  ;;  %v54_v7 = vcombine.high %v22_v63, %v22_v63 }
  0x10   :  { %93 = vadd.xlane.f32.xlu0 %v92_v35  ;;  %v152_v8 = vadd.f32 %v151_v4, %v150_v2  ;;  %v112_v9 = vadd.f32 %v111_v5, %v110_v3  ;;  %v155_v10 = vsel %vm79_vm0, %v30_v62, 0.0  ;;  %v115_v12 = vsel %vm79_vm0, %v22_v63, 0.0 }
  0x11   :  { %v156_v11 = vsel %vm79_vm0, %v62_v6, 0.0  ;;  %v116_v13 = vsel %vm79_vm0, %v54_v7, 0.0  ;;  %v405_v17 = vmov 0.0   ;;  %v327_v18 = vsel %vm325_vm1, %v193_v16, 0 }
  0x12   :  { %v157_v14 = vadd.f32 %v156_v11, %v155_v10  ;;  %v117_v15 = vadd.f32 %v116_v13, %v115_v12  ;;  %381 = vmatprep.subr.bf16.mxu0 %v405_v17  ;;  %383 = vmatprep.mubr.msk.bf16.mxu0 %vm406_vm2, %v405_v17  ;;  %v233_v25 = vlaneseq  ;;  %vm307_vm7 = vcmask 1045509  }
  0x13   :  { %138 = vadd.xlane.f32.xlu1 %v137_v44  ;;  %382 = vmatpush3.bf16.msra.mxu0 %v327_v18  ;;  %vm309_vm8 = vcmask 1046534   ;;  %vm311_vm9 = vcmask 1047559   ;;  %vm321_vm10 = vcmask 31744   ;;  %vm370_vm11 = vcmask 261120  }
  0x14   :  { %98 = vadd.xlane.f32.xlu0 %v97_v45  ;;  %v234_v32 = vand.u32 127, %v233_v25  ;;  %v236_v33 = vshrl.u32 %v233_v25, 7 }
  0x16   :  { %v510_v46 = vsub.s32 %v234_v32, %v236_v33 }
  0x17   :  { %143 = vadd.xlane.f32.xlu1 %v142_v54 }
  0x18   :  { %103 = vadd.xlane.f32.xlu0 %v102_v55 }
  0x1b   :  { %148 = vadd.xlane.f32.xlu1 %v147_v0 }
  0x1c   :  { %108 = vadd.xlane.f32.xlu0 %v107_v1 }
  0x1f   :  { %153 = vadd.xlane.f32.xlu1 %v152_v8 }
  0x20   :  { %113 = vadd.xlane.f32.xlu0 %v112_v9 }
  0x23   :  { %158 = vadd.xlane.f32.xlu1 %v157_v14 }
  0x24   :  { %118 = vadd.xlane.f32.xlu0 %v117_v15 }
  0x94   :  { %v124_v19 = vpop.xlane.xlu1 %123 }
  0x95   :  { %v84_v20 = vpop.xlane.xlu0 %83  ;;  %v169_v28 = vmul.f32 0.00390625, %v124_v19 }
  0x96   :  { %v161_v29 = vmul.f32 0.00390625, %v84_v20 }
  0x97   :  { %v185_v36 = vpack.c.bf16 %v169_v28, %v169_v28 }
  0x98   :  { %v129_v21 = vpop.xlane.xlu1 %128  ;;  %v177_v37 = vpack.c.bf16 %v161_v29, %v161_v29 }
  0x99   :  { %v89_v22 = vpop.xlane.xlu0 %88  ;;  %v170_v26 = vmul.f32 0.00390625, %v129_v21  ;;  %v225_v49 = vunpack.c.l.b16 %v185_v36 }
  0x9a   :  { %v162_v27 = vmul.f32 0.00390625, %v89_v22  ;;  %v217_v50 = vunpack.c.l.b16 %v177_v37 }
  0x9b   :  { %v186_v34 = vpack.c.bf16 %v170_v26, %v170_v26  ;;  %v270_v5 = vrot.slane %v225_v49, %v510_v46 }
  0x9c   :  { %v134_v23 = vpop.xlane.xlu1 %133  ;;  %v178_v35 = vpack.c.bf16 %v162_v27, %v162_v27  ;;  %v238_v6 = vrot.slane %v217_v50, %v510_v46 }
  0x9d   :  { %v94_v24 = vpop.xlane.xlu0 %93  ;;  %v171_v38 = vmul.f32 0.00390625, %v134_v23  ;;  %v226_v47 = vunpack.c.l.b16 %v186_v34 }
  0x9e   :  { %v163_v39 = vmul.f32 0.00390625, %v94_v24  ;;  %v218_v48 = vunpack.c.l.b16 %v178_v35 }
  0x9f   :  { %v187_v51 = vpack.c.bf16 %v171_v38, %v171_v38  ;;  %v274_v61 = vrot.slane %v226_v47, %v510_v46 }
  0xa0   :  { %v139_v30 = vpop.xlane.xlu1 %138  ;;  %v179_v52 = vpack.c.bf16 %v163_v39, %v163_v39  ;;  %v242_v62 = vrot.slane %v218_v48, %v510_v46 }
  0xa1   :  { %v99_v31 = vpop.xlane.xlu0 %98  ;;  %v172_v42 = vmul.f32 0.00390625, %v139_v30  ;;  %v227_v1 = vunpack.c.l.b16 %v187_v51  ;;  %v313_v13 = vsel %vm299_vm3, %v274_v61, %v270_v5 }
  0xa2   :  { %v164_v43 = vmul.f32 0.00390625, %v99_v31  ;;  %v219_v2 = vunpack.c.l.b16 %v179_v52  ;;  %v300_v14 = vsel %vm299_vm3, %v242_v62, %v238_v6 }
  0xa3   :  { %v188_v55 = vpack.c.bf16 %v172_v42, %v172_v42  ;;  %v278_v17 = vrot.slane %v227_v1, %v510_v46 }
  0xa4   :  { %v144_v40 = vpop.xlane.xlu1 %143  ;;  %v180_v56 = vpack.c.bf16 %v164_v43, %v164_v43  ;;  %v246_v18 = vrot.slane %v219_v2, %v510_v46 }
  0xa5   :  { %v104_v41 = vpop.xlane.xlu0 %103  ;;  %v173_v44 = vmul.f32 0.00390625, %v144_v40  ;;  %v228_v7 = vunpack.c.l.b16 %v188_v55  ;;  %v314_v35 = vsel %vm301_vm4, %v278_v17, %v313_v13  ;;  %v377_v55 = vld [vmem:[%s551_s2] ss:$0 sm:$0xff] }
  0xa6   :  { %v165_v45 = vmul.f32 0.00390625, %v104_v41  ;;  %v220_v8 = vunpack.c.l.b16 %v180_v56  ;;  %v302_v36 = vsel %vm301_vm4, %v246_v18, %v300_v14 }
  0xa7   :  { %v189_v59 = vpack.c.bf16 %v173_v44, %v173_v44  ;;  %v282_v23 = vrot.slane %v228_v7, %v510_v46 }
  0xa8   :  { %v149_v53 = vpop.xlane.xlu1 %148  ;;  %v181_v60 = vpack.c.bf16 %v165_v45, %v165_v45  ;;  %v250_v24 = vrot.slane %v220_v8, %v510_v46 }
  0xa9   :  { %v109_v54 = vpop.xlane.xlu0 %108  ;;  %v174_v57 = vmul.f32 0.00390625, %v149_v53  ;;  %v229_v9 = vunpack.c.l.b16 %v189_v59  ;;  %v315_v39 = vsel %vm303_vm5, %v282_v23, %v314_v35 }
  0xaa   :  { %v166_v58 = vmul.f32 0.00390625, %v109_v54  ;;  %v221_v10 = vunpack.c.l.b16 %v181_v60  ;;  %v304_v40 = vsel %vm303_vm5, %v250_v24, %v302_v36 }
  0xab   :  { %v190_v63 = vpack.c.bf16 %v174_v57, %v174_v57  ;;  %v286_v27 = vrot.slane %v229_v9, %v510_v46 }
  0xac   :  { %v182_v0 = vpack.c.bf16 %v166_v58, %v166_v58  ;;  %v154_v3 = vpop.xlane.xlu1 %153  ;;  %v254_v28 = vrot.slane %v221_v10, %v510_v46 }
  0xad   :  { %v114_v4 = vpop.xlane.xlu0 %113  ;;  %v175_v11 = vmul.f32 0.00390625, %v154_v3  ;;  %v230_v15 = vunpack.c.l.b16 %v190_v63  ;;  %v316_v43 = vsel %vm305_vm6, %v286_v27, %v315_v39 }
  0xae   :  { %v167_v12 = vmul.f32 0.00390625, %v114_v4  ;;  %v222_v16 = vunpack.c.l.b16 %v182_v0  ;;  %v306_v44 = vsel %vm305_vm6, %v254_v28, %v304_v40 }
  0xaf   :  { %v191_v19 = vpack.c.bf16 %v175_v11, %v175_v11  ;;  %v290_v31 = vrot.slane %v230_v15, %v510_v46 }
  0xb0   :  { %v183_v20 = vpack.c.bf16 %v167_v12, %v167_v12  ;;  %v159_v21 = vpop.xlane.xlu1 %158  ;;  %v258_v32 = vrot.slane %v222_v16, %v510_v46 }
  0xb1   :  { %v119_v22 = vpop.xlane.xlu0 %118  ;;  %v176_v25 = vmul.f32 0.00390625, %v159_v21  ;;  %v231_v29 = vunpack.c.l.b16 %v191_v19  ;;  %v317_v45 = vsel %vm307_vm7, %v290_v31, %v316_v43 }
  0xb2   :  { %v168_v26 = vmul.f32 0.00390625, %v119_v22  ;;  %v223_v30 = vunpack.c.l.b16 %v183_v20  ;;  %v308_v47 = vsel %vm307_vm7, %v258_v32, %v306_v44 }
  0xb3   :  { %v192_v33 = vpack.c.bf16 %v176_v25, %v176_v25  ;;  %v294_v37 = vrot.slane %v231_v29, %v510_v46 }
  0xb4   :  { %v184_v34 = vpack.c.bf16 %v168_v26, %v168_v26  ;;  %v262_v38 = vrot.slane %v223_v30, %v510_v46 }
  0xb5   :  { %v232_v41 = vunpack.c.l.b16 %v192_v33  ;;  %v318_v50 = vsel %vm309_vm8, %v294_v37, %v317_v45 }
  0xb6   :  { %v224_v42 = vunpack.c.l.b16 %v184_v34  ;;  %v310_v51 = vsel %vm309_vm8, %v262_v38, %v308_v47 }
  0xb7   :  { %v298_v48 = vrot.slane %v232_v41, %v510_v46 }
  0xb8   :  { %v266_v49 = vrot.slane %v224_v42, %v510_v46 }
  0xb9   :  { %v319_v52 = vsel %vm311_vm9, %v298_v48, %v318_v50 }
  0xba   :  { %v312_v53 = vsel %vm311_vm9, %v266_v49, %v310_v51 }
  0xbb   :  { %v320_v54 = vpack.c.b16 %v319_v52, %v312_v53 }
  0xbd   :  { %384 = vmatmul.mubr.msk.bf16.vlgmr.msra.gmra.mrb[0].mxu0 %vm321_vm10, %v320_v54 }
 0x190   :  { %v363_v56 = vpop.f32.mrb[0].mxu0 }
 0x191   :  { %v364_v57 = vadd.f32 %v377_v55, %v363_v56  ;;  %v385_v58 = vpop.f32.mrb[1].mxu0 }
 0x192   :  { %v366_v59 = vpop.f32.mrb[2].mxu0 }
 0x193   :  { %371 = vst.msk [vmem:[%s552_s3] sm:$0xff] %vm370_vm11, %v364_v57  ;;  %v367_v46 = vadd.f32 %v377_v55, %v366_v59  ;;  %v386_v60 = vpop.f32.mrb[3].mxu0 }
 0x195   :  { %372 = vst.msk [vmem:[%s552_s3 + $0x8] sm:$0xff] %vm370_vm11, %v367_v46 }

// kernel: view_mamba_aggregate2.5
= control target key start
LH: loop header
LB: loop body
LE: loop exit
PB: predicated region body
PF: predicated region fallthrough
CT: control target
= control target key end

     0   :  { %s1513_s25 = smov 0   ;;  %s1730_s0 = inlined_call_operand.vmem [shape: f32[2,8,32], index: 0, kind: input, shape index: {}]   ;;  %s1731_s1 = inlined_call_operand.vmem [shape: bf16[32,64], index: 1, kind: input, shape index: {}]   ;;  %s1732_s2 = inlined_call_operand.vmem [shape: bf16[32,64], index: 2, kind: input, shape index: {}]   ;;  %s1733_s3 = inlined_call_operand.vmem [shape: f32[4,64], index: 3, kind: input, shape index: {}]   ;;  %s1734_s4 = inlined_call_operand.vmem [shape: f32[1,64], index: 4, kind: input, shape index: {}]   ;;  %s1735_s5 = inlined_call_operand.vmem [shape: bf16[64,2], index: 5, kind: input, shape index: {}]   ;;  %s1736_s6 = inlined_call_operand.vmem [shape: bf16[8,64], index: 6, kind: input, shape index: {}]   ;;  %s1737_s7 = inlined_call_operand.vmem [shape: bf16[8,64], index: 7, kind: input, shape index: {}]   ;;  %s1738_s8 = inlined_call_operand.vmem [shape: bf16[2,64], index: 8, kind: input, shape index: {}]   ;;  %s1739_s9 = inlined_call_operand.vmem [shape: f32[1,64], index: 9, kind: input, shape index: {}]   ;;  %s1740_s10 = inlined_call_operand.vmem [shape: f32[8,64], index: 10, kind: input, shape index: {}]   ;;  %s1741_s11 = inlined_call_operand.vmem [shape: f32[1,64], index: 11, kind: input, shape index: {}]   ;;  %s1742_s12 = inlined_call_operand.vmem [shape: bf16[64,32], index: 12, kind: input, shape index: {}]   ;;  %s1743_s13 = inlined_call_operand.vmem [shape: f32[2,8,32], index: 13, kind: output, shape index: {}]  }
   0x1 LB: > { %s1235_s26 = sadd.s32 4294967295, %s1431_s25   ;;  %p1239_p0 = scmp.ge.s32.totalorder %s1431_s25, 1  ;;  %s1431_s25 = sphi %s1513_s25, %s23_s25  }
   0x2   : > { %p386_p1 = scmp.lt.s32.totalorder %s1431_s25, 3 }
   0x4   : > { %p387_p2 = pnand %p1239_p0, %p386_p1 }
   0x5   : > { %v1385_v0 = vld [vmem:[%s1731_s1] sm:$0xff] (!%p387_p2)   ;;  %v1433_v1 = vmov (!%p387_p2), 0.0   ;;  %v1386_v2 = vld [vmem:[%s1731_s1 + $0x8] sm:$0xff] (!%p387_p2)   ;;  %vm1434_vm0 = vmmov (!%p387_p2), 0   ;;  %p428_p3 = scmp.lt.s32.totalorder (!%p387_p2), %s1235_s26, 1  ;;  %vm455_vm1 = vcmask (!%p387_p2), 261120  }
   0x6   : > { %390 = sbr.rel (%p387_p2) target bundleno = 1036 (0x40c), region = 72  ;;  %1292 = vmatprep.subr.bf16.mxu0 (!%p387_p2), %v1433_v1  ;;  %1300 = vmatprep.subr.bf16.mxu1 (!%p387_p2), %v1433_v1  ;;  %vm555_vm2 = vcmask (!%p387_p2), 523264   ;;  %vm557_vm3 = vcmask (!%p387_p2), 518144   ;;  %v1387_v5 = vld [vmem:[%s1735_s5] sm:$0xff] (!%p387_p2)   ;;  %v1389_v7 = vld [vmem:[%s1735_s5 + $0x8] sm:$0xff] (!%p387_p2)   ;;  %v1391_v9 = vld [vmem:[%s1735_s5 + $0x10] sm:$0xff] (!%p387_p2)  }
   0x7   : > { %1293 = vmatpush3.bf16.msra.mxu0 (!%p387_p2), %v1385_v0  ;;  %1296 = vmatprep.mubr.msk.bf16.mxu0 (!%p387_p2), %vm1434_vm0, %v1433_v1  ;;  %556 = vst.msk [vmem:[#allocation2] sm:$0xff] (!%p387_p2), %vm555_vm2, %v1433_v1  ;;  %v1388_v6 = vld [vmem:[%s1732_s2] sm:$0xff] (!%p387_p2)   ;;  %v1390_v8 = vld [vmem:[%s1732_s2 + $0x8] sm:$0xff] (!%p387_p2)   ;;  %v1392_v10 = vld [vmem:[%s1735_s5 + $0x18] sm:$0xff] (!%p387_p2)   ;;  %vm782_vm4 = vcmask (!%p387_p2), 1040384   ;;  %v1435_v46 = vmov (!%p387_p2), 2  }
   0x8   : > { %1294 = vmatprep.subr.bf16.mxu0 (!%p387_p2), %v1433_v1  ;;  %1304 = vmatprep.mubr.msk.bf16.mxu1 (!%p387_p2), %vm1434_vm0, %v1433_v1  ;;  %558 = vst.msk [vmem:[#allocation2 + $0x8] sm:$0x7] (!%p387_p2), %vm557_vm3, %v1433_v1  ;;  %v1249_v15 = vld [vmem:[%s1733_s3] ss:$0 sm:$0xff] (!%p387_p2)  ;;  %v1250_v19 = vld [vmem:[%s1733_s3 + $0x1] ss:$0 sm:$0xff] (!%p387_p2) }
   0x9   : > { %1301 = vmatpush3.bf16.msra.mxu1 (!%p387_p2), %v1388_v6  ;;  %v1248_v16 = vld [vmem:[%s1734_s4] ss:$0 sm:$0xff] (!%p387_p2)  ;;  %v1251_v22 = vld [vmem:[%s1733_s3 + $0x2] ss:$0 sm:$0xff] (!%p387_p2)  ;;  %v1252_v26 = vld [vmem:[%s1733_s3 + $0x3] ss:$0 sm:$0xff] (!%p387_p2)  ;;  %1370 = vset.pattern.permute.xlu1 (!%p387_p2), %v1435_v46 }
   0xa   : > { %1302 = vmatprep.subr.bf16.mxu1 (!%p387_p2), %v1433_v1  ;;  %v770_v37 = vld [vmem:[%s1738_s8] sm:$0x1] (!%p387_p2)  ;;  %v1436_v49 = vmov (!%p387_p2), 0   ;;  %vm778_vm5 = vcmask (!%p387_p2), 15360   ;;  %v1437_v59 = vmov (!%p387_p2), 3   ;;  %v1438_v60 = vmov (!%p387_p2), 1  }
   0xb   : > { %1295 = vmatpush3.bf16.msra.mxu0 (!%p387_p2), %v1386_v2  ;;  %v784_v40 = vsel (!%p387_p2), %vm782_vm4, %v770_v37, 0  ;;  %v681_v42 = vld [vmem:[%s1736_s6] sm:$0xf] (!%p387_p2)  ;;  %1368 = vset.pattern.permute.xlu0 (!%p387_p2), %v1436_v49  ;;  %v1439_v63 = vmov (!%p387_p2), 4   ;;  %v1440_v0 = vmov (!%p387_p2), 5   ;;  %vm869_vm6 = vcmask (!%p387_p2), 516096  }
   0xc   : > { %1308 = vmatprep.subr.bf16.mxu0 (!%p387_p2), %v1433_v1  ;;  %v725_v43 = vld [vmem:[%s1737_s7] sm:$0xf] (!%p387_p2) }
   0xd   : > { %s1745_s26 = smov (!%p428_p3, %s1235_s26), 1  ;;  %1303 = vmatpush3.bf16.msra.mxu1 %v1390_v8  ;;  %v1393_v6 = vld [vmem:[%s1742_s12] sm:$0xff]   ;;  %v1395_v8 = vld [vmem:[%s1742_s12 + $0x10] sm:$0xff]  }
   0xe   : > { %s1240_s14 = sshll.u32 %s1745_s26, 3  ;;  %1320 = vmatprep.subr.bf16.mxu1 %v1433_v1 }
   0xf   : > { %s431_s17 = scalar_lea.vmem %s1730_s0, %s1240_s14  ;;  %s435_s20 = scalar_lea.vmem %s1743_s13, %s1240_s14 }
  0x10   : > { %v437_v3 = vld [vmem:[%s431_s17] sm:$0xff] }
  0x11   : > { %v438_v4 = vpack.c.bf16 %v437_v3, %v437_v3 }
  0x13   : > { %1297 = vmatmul.mubr.msk.bf16.vlgmr.msra.gmra.mrb[0].mxu0 %vm455_vm1, %v438_v4  ;;  %1305 = vmatmul.mubr.msk.bf16.vlgmr.msra.gmra.mrb[0].mxu1 %vm455_vm1, %v438_v4  ;;  %v1441_v4 = vmov 6  }
  0x14   : > { %1316 = vmatprep.mubr.msk.bf16.mxu0 %vm1434_vm0, %v1433_v1  ;;  %1309 = vmatpush3.bf16.msra.mxu0 %v1387_v5  ;;  %v1442_v5 = vmov 7  }
  0x15   : > { %1310 = vmatprep.subr.bf16.mxu0 %v1433_v1  ;;  %1322 = vmatprep.mubr.msk.bf16.mxu1 %vm1434_vm0, %v1433_v1 }
  0x18   : > { %1311 = vmatpush3.bf16.msra.mxu0 %v1389_v7  ;;  %v1394_v7 = vld [vmem:[%s1742_s12 + $0x8] sm:$0xff]  }
  0x19   : > { %1312 = vmatprep.subr.bf16.mxu0 %v1433_v1 }
  0x1c   : > { %1313 = vmatpush3.bf16.msra.mxu0 %v1391_v9  ;;  %v1396_v9 = vld [vmem:[%s1742_s12 + $0x18] sm:$0xff]  }
  0x1d   : > { %1314 = vmatprep.subr.bf16.mxu0 %v1433_v1 }
  0x20   : > { %1315 = vmatpush3.bf16.msra.mxu0 %v1392_v10  ;;  %v1260_v10 = vld [vmem:[%s1739_s9] ss:$0 sm:$0xff] }
  0x21   : > { %1332 = vmatprep.subr.bf16.mxu0 %v1433_v1 }
  0xe6   : > { %v493_v11 = vpop.f32.mrb[0].mxu0  ;;  %v1617_v44 = vpop.f32.mrb[0].mxu1 }
  0xe7   : > { %559 = vst.msk [vmem:[#allocation2 + $0x3] sm:$0xff] %vm555_vm2, %v493_v11  ;;  %v1298_v12 = vpop.f32.mrb[1].mxu0  ;;  %v1306_v45 = vpop.f32.mrb[1].mxu1 }
  0xe8   : > { %v496_v13 = vpop.f32.mrb[2].mxu0  ;;  %v552_v47 = vpop.f32.mrb[2].mxu1 }
  0xe9   : > { %v1299_v14 = vpop.f32.mrb[3].mxu0  ;;  %v1307_v48 = vpop.f32.mrb[3].mxu1 }
  0xee   : > { %v567_v17 = vld [vmem:[#allocation2] sm:$0xff] }
  0xef   : > { %v575_v18 = vld [vmem:[#allocation2 + $0x1] sm:$0xff]  ;;  %v573_v20 = vmul.f32 %v1249_v15, %v567_v17 }
  0xf0   : > { %v583_v21 = vld [vmem:[#allocation2 + $0x2] sm:$0xff]  ;;  %v581_v24 = vmul.f32 %v1250_v19, %v575_v18 }
  0xf1   : > { %v574_v23 = vadd.f32 %v1248_v16, %v573_v20  ;;  %v591_v25 = vld [vmem:[#allocation2 + $0x3] sm:$0xff]  ;;  %v589_v28 = vmul.f32 %v1251_v22, %v583_v21  ;;  %v836_v21 = vlaneseq }
  0xf2   : > { %v597_v30 = vmul.f32 %v1252_v26, %v591_v25 }
  0xf3   : > { %v582_v27 = vadd.f32 %v581_v24, %v574_v23  ;;  %v1637_v22 = vshrl.u32 %v836_v21, 7 }
  0xf5   : > { %v590_v29 = vadd.f32 %v589_v28, %v582_v27  ;;  %v838_v26 = vsub.s32 0, %v1637_v22  ;;  %v873_v28 = vsub.s32 1, %v1637_v22 }
  0xf7   : > { %v598_v31 = vadd.f32 %v597_v30, %v590_v29  ;;  %v1644_v29 = vld [vmem:[%s1740_s10] sm:$0xff]  ;;  %v904_v30 = vsub.s32 2, %v1637_v22 }
  0xf9   : > { %v599_v32 = vsub.f32 0.0, %v598_v31 }
  0xfb   : > { %v600_v33 = vmul.f32 1.442695, %v599_v32 }
  0xfd   : > { %1397 = vpow2.f32 %v600_v33 }
 0x107   : > { %v1398_v34 = vpop.eup %1397 }
 0x108   : > { %v602_v35 = vadd.f32 1.0, %v1398_v34 }
 0x10a   : > { %1399 = vrcp.f32 %v602_v35 }
 0x114   : > { %v1400_v36 = vpop.eup %1399 }
 0x115   : > { %v1595_v38 = vmul.f32 %v1400_v36, %v598_v31  ;;  %v935_v36 = vsub.s32 3, %v1637_v22 }
 0x117   : > { %v605_v39 = vpack.c.bf16 %v1595_v38, %v1595_v38 }
 0x119   : > { %1317 = vmatmul.mubr.msk.bf16.vlgmr.msra.gmra.mrb[4].mxu0 %vm555_vm2, %v605_v39  ;;  %v639_v41 = vsel %vm555_vm2, %v605_v39, 0 }
 0x11a   : > { %1321 = vmatpush3.bf16.xpose.msra.mxu1 %v639_v41  ;;  %1333 = vmatpush3.bf16.msra.mxu0 %v784_v40 }
 0x11b   : > { %1326 = vmatprep.subr.bf16.mxu1 %v1433_v1  ;;  %1334 = vmatprep.mubr.msk.bf16.mxu0 %vm1434_vm0, %v1433_v1 }
 0x121   : > { %1323 = vmatmul.mubr.msk.bf16.vlgmr.msra.gmra.mrb[4].mxu1 %vm555_vm2, %v681_v42 }
 0x122   : > { %1327 = vmatpush3.bf16.xpose.msra.mxu1 %v639_v41  ;;  %1328 = vmatprep.mubr.msk.bf16.mxu1 %vm1434_vm0, %v1433_v1  ;;  %v966_v41 = vsub.s32 4, %v1637_v22 }
 0x123   : > { %1338 = vmatprep.subr.bf16.mxu1 %v1433_v1 }
 0x129   : > { %1329 = vmatmul.mubr.msk.bf16.vlgmr.msra.gmra.mrb[8].mxu1 %vm555_vm2, %v725_v43 }
 0x12a   : > { %1346 = vmatprep.mubr.msk.bf16.mxu1 %vm1434_vm0, %v1433_v1  ;;  %1339 = vmatpush3.bf16.msra.mxu1 %v1393_v6 }
 0x12b   : > { %1340 = vmatprep.subr.bf16.mxu1 %v1433_v1 }
 0x12e   : > { %1341 = vmatpush3.bf16.msra.mxu1 %v1394_v7 }
 0x12f   : > { %1342 = vmatprep.subr.bf16.mxu1 %v1433_v1 }
 0x132   : > { %1343 = vmatpush3.bf16.msra.mxu1 %v1395_v8 }
 0x133   : > { %1344 = vmatprep.subr.bf16.mxu1 %v1433_v1 }
 0x136   : > { %1345 = vmatpush3.bf16.msra.mxu1 %v1396_v9 }
 0x1ec   : > { %v675_v50 = vpop.f32.mrb[4].mxu0 }
 0x1ed   : > { %v769_v51 = vpack.c.bf16 %v675_v50, %v675_v50  ;;  %v1318_v52 = vpop.f32.mrb[5].mxu0 }
 0x1ee   : > { %v678_v53 = vpop.f32.mrb[6].mxu0 }
 0x1ef   : > { %v1319_v54 = vpop.f32.mrb[7].mxu0  ;;  %1335 = vmatmul.mubr.msk.bf16.vlgmr.msra.gmra.mrb[8].mxu0 %vm778_vm5, %v769_v51 }
 0x1f4   : > { %v719_v55 = vpop.f32.mrb[4].mxu1 }
 0x1f5   : > { %915 = vperm.xlu1 %1370, %v719_v55   ;;  %851 = vperm.xlu0 %1368, %v719_v55   ;;  %v1324_v56 = vpop.f32.mrb[5].mxu1 }
 0x1f6   : > { %v722_v57 = vpop.f32.mrb[6].mxu1 }
 0x1f7   : > { %v1325_v58 = vpop.f32.mrb[7].mxu1 }
 0x1f9   : > { %1371 = vset.pattern.permute.xlu1 %v1437_v59  ;;  %1369 = vset.pattern.permute.xlu0 %v1438_v60 }
 0x1fa   : > { %946 = vperm.xlu1 %1371, %v719_v55   ;;  %884 = vperm.xlu0 %1369, %v719_v55  }
 0x1fc   : > { %v763_v61 = vpop.f32.mrb[8].mxu1 }
 0x1fd   : > { %v1330_v62 = vpop.f32.mrb[9].mxu1 }
 0x1fe   : > { %1372 = vset.pattern.permute.xlu1 %v1439_v63  ;;  %1373 = vset.pattern.permute.xlu0 %v1440_v0  ;;  %v766_v2 = vpop.f32.mrb[10].mxu1 }
 0x1ff   : > { %977 = vperm.xlu1 %1372, %v719_v55   ;;  %1008 = vperm.xlu0 %1373, %v719_v55   ;;  %v1331_v3 = vpop.f32.mrb[11].mxu1 }
 0x203   : > { %1374 = vset.pattern.permute.xlu1 %v1441_v4  ;;  %1376 = vset.pattern.permute.xlu0 %v1436_v49  ;;  %v997_v49 = vsub.s32 5, %v1637_v22 }
 0x204   : > { %1039 = vperm.xlu1 %1374, %v719_v55   ;;  %858 = vperm.xlu0 %1376, %v763_v61  }
 0x208   : > { %1375 = vset.pattern.permute.xlu1 %v1442_v5  ;;  %1379 = vset.pattern.permute.xlu0 %v1437_v59 }
 0x209   : > { %1070 = vperm.xlu1 %1375, %v719_v55   ;;  %952 = vperm.xlu0 %1379, %v763_v61   ;;  %v1028_v55 = vsub.s32 6, %v1637_v22 }
 0x20d   : > { %1377 = vset.pattern.permute.xlu1 %v1438_v60  ;;  %1382 = vset.pattern.permute.xlu0 %v1441_v4 }
 0x20e   : > { %890 = vperm.xlu1 %1377, %v763_v61   ;;  %1045 = vperm.xlu0 %1382, %v763_v61  }
 0x212   : > { %1378 = vset.pattern.permute.xlu1 %v1435_v46  ;;  %1384 = vset.pattern.permute.xlu0 %v1442_v5 }
 0x213   : > { %921 = vperm.xlu1 %1378, %v763_v61  }
 0x217   : > { %1380 = vset.pattern.permute.xlu1 %v1439_v63 }
 0x218   : > { %983 = vperm.xlu1 %1380, %v763_v61  }
 0x21c   : > { %1381 = vset.pattern.permute.xlu1 %v1440_v0  ;;  %v1059_v0 = vsub.s32 7, %v1637_v22 }
 0x21d   : > { %1014 = vperm.xlu1 %1381, %v763_v61  }
 0x221   : > { %1383 = vset.pattern.permute.xlu1 %v1442_v5 }
 0x222   : > { %1076 = vperm.xlu1 %1383, %v763_v61  }
 0x274   : > { %v916_v25 = vpop.permute.xlu1 %915  ;;  %v852_v37 = vpop.permute.xlu0 %851 }
 0x279   : > { %v1647_v33 = vpop.permute.xlu1 %946  ;;  %v885_v47 = vpop.permute.xlu0 %884 }
 0x27e   : > { %v1654_v45 = vpop.permute.xlu1 %977  ;;  %v1666_v58 = vpop.permute.xlu0 %1008 }
 0x283   : > { %v1661_v53 = vpop.permute.xlu1 %1039  ;;  %v859_v6 = vpop.permute.xlu0 %858 }
 0x288   : > { %v1674_v4 = vpop.permute.xlu1 %1070 }
 0x2c2   : > { %v820_v11 = vpop.f32.mrb[8].mxu0 }
 0x2c3   : > { %v821_v12 = vadd.f32 %v1260_v10, %v820_v11  ;;  %v1336_v13 = vpop.f32.mrb[9].mxu0 }
 0x2c4   : > { %v823_v14 = vpop.f32.mrb[10].mxu0 }
 0x2c5   : > { %v827_v15 = vand.u32 2147483647, %v821_v12  ;;  %v1337_v16 = vpop.f32.mrb[11].mxu0  ;;  %v826_v23 = vmax.f32 %v821_v12, 0.0 }
 0x2c6   : > { %v891_v16 = vpop.permute.xlu1 %890 }
 0x2c7   : > { %v828_v17 = vsub.f32 0.0, %v827_v15 }
 0x2c9   : > { %v829_v18 = vmul.f32 1.442695, %v828_v17 }
 0x2cb   : > { %1401 = vpow2.f32 %v829_v18 }
 0x2d5   : > { %v1402_v19 = vpop.eup %1401 }
 0x2d6   : > { %v831_v20 = vadd.f32 1.0, %v1402_v19 }
 0x2d8   : > { %1403 = vlog2.f32 %v831_v20 }
 0x2e2   : > { %v1404_v1 = vpop.eup %1403 }
 0x2e3   : > { %v833_v24 = vmul.f32 0.6931472, %v1404_v1 }
 0x2e5   : > { %v834_v27 = vadd.f32 %v833_v24, %v826_v23 }
 0x2e7   : > { %v839_v31 = vrot.slane %v834_v27, %v838_v26  ;;  %v874_v32 = vrot.slane %v834_v27, %v873_v28  ;;  %v905_v35 = vrot.slane %v834_v27, %v904_v30  ;;  %v936_v43 = vrot.slane %v834_v27, %v935_v36 }
 0x2e8   : > { %v1657_v48 = vmul.f32 %v834_v27, %v1595_v38  ;;  %v967_v52 = vrot.slane %v834_v27, %v966_v41  ;;  %v998_v59 = vrot.slane %v834_v27, %v997_v49  ;;  %v1029_v3 = vrot.slane %v834_v27, %v1028_v55 }
 0x2e9   : > { %v840_v34 = vmul.f32 %v839_v31, %v1644_v29  ;;  %v875_v40 = vmul.f32 %v874_v32, %v1644_v29  ;;  %v906_v42 = vmul.f32 %v905_v35, %v1644_v29  ;;  %v937_v51 = vmul.f32 %v936_v43, %v1644_v29  ;;  %v922_v35 = vpop.permute.xlu1 %921 }
 0x2ea   : > { %v848_v54 = vrot.slane %v1657_v48, %v838_v26  ;;  %v968_v57 = vmul.f32 %v967_v52, %v1644_v29  ;;  %v882_v63 = vrot.slane %v1657_v48, %v873_v28  ;;  %v999_v5 = vmul.f32 %v998_v59, %v1644_v29 }
 0x2eb   : > { %v841_v39 = vmul.f32 1.442695, %v840_v34  ;;  %v876_v46 = vmul.f32 1.442695, %v875_v40  ;;  %v907_v50 = vmul.f32 1.442695, %v906_v42  ;;  %v913_v9 = vrot.slane %v1657_v48, %v904_v30 }
 0x2ec   : > { %v938_v56 = vmul.f32 1.442695, %v937_v51  ;;  %v854_v62 = vmul.f32 %v852_v37, %v848_v54  ;;  %v969_v2 = vmul.f32 1.442695, %v968_v57  ;;  %v887_v10 = vmul.f32 %v885_v47, %v882_v63  ;;  %v953_v57 = vpop.permute.xlu0 %952 }
 0x2ed   : > { %1405 = vpow2.f32 %v841_v39  ;;  %v1030_v13 = vmul.f32 %v1029_v3, %v1644_v29  ;;  %v1060_v14 = vrot.slane %v834_v27, %v1059_v0  ;;  %v1000_v15 = vmul.f32 1.442695, %v999_v5  ;;  %v984_v63 = vpop.permute.xlu1 %983 }
 0x2ee   : > { %1407 = vpow2.f32 %v876_v46  ;;  %v918_v21 = vmul.f32 %v916_v25, %v913_v9  ;;  %v944_v1 = vrot.slane %v1657_v48, %v935_v36  ;;  %v975_v25 = vrot.slane %v1657_v48, %v966_v41 }
 0x2ef   : > { %1409 = vpow2.f32 %v907_v50  ;;  %v1031_v26 = vmul.f32 1.442695, %v1030_v13  ;;  %v1061_v28 = vmul.f32 %v1060_v14, %v1644_v29  ;;  %v1098_v29 = vsub.f32 0.0, %v1617_v44 }
 0x2f0   : > { %1411 = vpow2.f32 %v938_v56  ;;  %v949_v39 = vmul.f32 %v1647_v33, %v944_v1  ;;  %v980_v33 = vmul.f32 %v1654_v45, %v975_v25  ;;  %v1006_v41 = vrot.slane %v1657_v48, %v997_v49 }
 0x2f1   : > { %1413 = vpow2.f32 %v969_v2  ;;  %v1062_v42 = vmul.f32 1.442695, %v1061_v28  ;;  %v1037_v49 = vrot.slane %v1657_v48, %v1028_v55 }
 0x2f2   : > { %1415 = vpow2.f32 %v1000_v15  ;;  %v1011_v9 = vmul.f32 %v1666_v58, %v1006_v41  ;;  %v1068_v58 = vrot.slane %v1657_v48, %v1059_v0 }
 0x2f3   : > { %1417 = vpow2.f32 %v1031_v26  ;;  %v1042_v55 = vmul.f32 %v1661_v53, %v1037_v49  ;;  %v1046_v53 = vpop.permute.xlu0 %1045 }
 0x2f4   : > { %1419 = vpow2.f32 %v1062_v42  ;;  %v1073_v22 = vmul.f32 %v1674_v4, %v1068_v58 }
 0x2f7   : > { %v1406_v60 = vpop.eup %1405 }
 0x2f8   : > { %v843_v61 = vmul.f32 0.0, %v1406_v60  ;;  %v1408_v8 = vpop.eup %1407 }
 0x2f9   : > { %v1410_v19 = vpop.eup %1409 }
 0x2fa   : > { %v855_v7 = vadd.f32 %v854_v62, %v843_v61  ;;  %v1412_v32 = vpop.eup %1411 }
 0x2fb   : > { %v1414_v51 = vpop.eup %1413 }
 0x2fc   : > { %v878_v11 = vmul.f32 %v1408_v8, %v855_v7  ;;  %v861_v12 = vmul.f32 %v859_v6, %v855_v7  ;;  %v1416_v6 = vpop.eup %1415 }
 0x2fe   : > { %v888_v17 = vadd.f32 %v887_v10, %v878_v11  ;;  %v862_v18 = vsel %vm555_vm2, %v861_v12, 0.0  ;;  %v1099_v12 = vmul.f32 1.442695, %v1098_v29 }
 0x2ff   : > { %v863_v20 = vrot.slane %v862_v18, 4 }
 0x300   : > { %v893_v23 = vmul.f32 %v891_v16, %v888_v17  ;;  %v909_v24 = vmul.f32 %v1410_v19, %v888_v17  ;;  %1421 = vpow2.f32 %v1099_v12 }
 0x301   : > { %v864_v30 = vadd.f32 %v863_v20, %v862_v18  ;;  %v1418_v18 = vpop.eup %1417 }
 0x302   : > { %v894_v31 = vsel %vm555_vm2, %v893_v23, 0.0  ;;  %v919_v27 = vadd.f32 %v918_v21, %v909_v24  ;;  %v1015_v21 = vpop.permute.xlu1 %1014 }
 0x303   : > { %v895_v34 = vrot.slane %v894_v31, 4  ;;  %v865_v37 = vrot.slane %v864_v30, 2 }
 0x304   : > { %v924_v40 = vmul.f32 %v922_v35, %v919_v27  ;;  %v940_v36 = vmul.f32 %v1412_v32, %v919_v27  ;;  %v1420_v32 = vpop.eup %1419 }
 0x305   : > { %v896_v43 = vadd.f32 %v895_v34, %v894_v31  ;;  %v866_v46 = vadd.f32 %v865_v37, %v864_v30 }
 0x306   : > { %v925_v47 = vsel %vm555_vm2, %v924_v40, 0.0  ;;  %v950_v50 = vadd.f32 %v949_v39, %v940_v36  ;;  %v1077_v29 = vpop.permute.xlu1 %1076 }
 0x307   : > { %v897_v52 = vrot.slane %v896_v43, 2  ;;  %v926_v54 = vrot.slane %v925_v47, 4  ;;  %v867_v56 = vrot.slane %v866_v46, 1 }
 0x308   : > { %v971_v59 = vmul.f32 %v1414_v51, %v950_v50  ;;  %v955_v60 = vmul.f32 %v953_v57, %v950_v50 }
 0x309   : > { %v898_v61 = vadd.f32 %v897_v52, %v896_v43  ;;  %v927_v62 = vadd.f32 %v926_v54, %v925_v47  ;;  %v868_v2 = vadd.f32 %v867_v56, %v866_v46 }
 0x30a   : > { %v981_v3 = vadd.f32 %v980_v33, %v971_v59  ;;  %v956_v5 = vsel %vm555_vm2, %v955_v60, 0.0  ;;  %v1422_v56 = vpop.eup %1421 }
 0x30b   : > { %v899_v7 = vrot.slane %v898_v61, 1  ;;  %v928_v8 = vrot.slane %v927_v62, 2  ;;  %870 = vst.msk [vmem:[#allocation3] sm:$0x1] %vm869_vm6, %v868_v2  ;;  %v957_v45 = vrot.slane %v956_v5, 4 }
 0x30c   : > { %v986_v10 = vmul.f32 %v984_v63, %v981_v3  ;;  %v1002_v11 = vmul.f32 %v1416_v6, %v981_v3 }
 0x30d   : > { %v900_v13 = vadd.f32 %v899_v7, %v898_v61  ;;  %v929_v14 = vadd.f32 %v928_v8, %v927_v62  ;;  %v958_v15 = vadd.f32 %v957_v45, %v956_v5  ;;  %v1101_v62 = vadd.f32 1.0, %v1422_v56  ;;  %v1262_v8 = vld [vmem:[%s1741_s11] ss:$0 sm:$0xff] }
 0x30e   : > { %v987_v16 = vsel %vm555_vm2, %v986_v10, 0.0  ;;  %v1012_v17 = vadd.f32 %v1011_v9, %v1002_v11  ;;  %v1096_v49 = vmul.f32 %v1262_v8, %v1595_v38 }
 0x30f   : > { %901 = vst.msk [vmem:[#allocation3 + $0x1] sm:$0x1] %vm869_vm6, %v900_v13  ;;  %v930_v19 = vrot.slane %v929_v14, 1  ;;  %v988_v20 = vrot.slane %v987_v16, 4  ;;  %v959_v1 = vrot.slane %v958_v15, 2  ;;  %1423 = vrcp.f32 %v1101_v62 }
 0x310   : > { %v1017_v23 = vmul.f32 %v1015_v21, %v1012_v17  ;;  %v1033_v24 = vmul.f32 %v1418_v18, %v1012_v17 }
 0x311   : > { %v931_v26 = vadd.f32 %v930_v19, %v929_v14  ;;  %v989_v28 = vadd.f32 %v988_v20, %v987_v16  ;;  %v960_v30 = vadd.f32 %v959_v1, %v958_v15 }
 0x312   : > { %v1018_v31 = vsel %vm555_vm2, %v1017_v23, 0.0  ;;  %v1043_v27 = vadd.f32 %v1042_v55, %v1033_v24 }
 0x313   : > { %932 = vst.msk [vmem:[#allocation3 + $0x2] sm:$0x1] %vm869_vm6, %v931_v26  ;;  %v990_v34 = vrot.slane %v989_v28, 2  ;;  %v1019_v35 = vrot.slane %v1018_v31, 4  ;;  %v961_v37 = vrot.slane %v960_v30, 1 }
 0x314   : > { %v1064_v39 = vmul.f32 %v1420_v32, %v1043_v27  ;;  %v1048_v48 = vmul.f32 %v1046_v53, %v1043_v27 }
 0x315   : > { %v991_v0 = vadd.f32 %v990_v34, %v989_v28  ;;  %v1020_v25 = vadd.f32 %v1019_v35, %v1018_v31  ;;  %v962_v40 = vadd.f32 %v961_v37, %v960_v30 }
 0x316   : > { %v1074_v36 = vadd.f32 %v1073_v22, %v1064_v39  ;;  %v1049_v42 = vsel %vm555_vm2, %v1048_v48, 0.0 }
 0x317   : > { %v992_v43 = vrot.slane %v991_v0, 1  ;;  %v1021_v46 = vrot.slane %v1020_v25, 2  ;;  %963 = vst.msk [vmem:[#allocation3 + $0x3] sm:$0x1] %vm869_vm6, %v962_v40  ;;  %v1050_v47 = vrot.slane %v1049_v42, 4 }
 0x318   : > { %v1079_v50 = vmul.f32 %v1077_v29, %v1074_v36 }
 0x319   : > { %v993_v51 = vadd.f32 %v992_v43, %v991_v0  ;;  %v1022_v52 = vadd.f32 %v1021_v46, %v1020_v25  ;;  %v1051_v54 = vadd.f32 %v1050_v47, %v1049_v42  ;;  %v1424_v45 = vpop.eup %1423 }
 0x31a   : > { %v1080_v4 = vsel %vm555_vm2, %v1079_v50, 0.0  ;;  %v1103_v10 = vmul.f32 %v1424_v45, %v1617_v44 }
 0x31b   : > { %994 = vst.msk [vmem:[#allocation3 + $0x4] sm:$0x1] %vm869_vm6, %v993_v51  ;;  %v1023_v57 = vrot.slane %v1022_v52, 1  ;;  %v1081_v33 = vrot.slane %v1080_v4, 4  ;;  %v1052_v41 = vrot.slane %v1051_v54, 2 }
 0x31d   : > { %v1024_v59 = vadd.f32 %v1023_v57, %v1022_v52  ;;  %v1082_v60 = vadd.f32 %v1081_v33, %v1080_v4  ;;  %v1053_v61 = vadd.f32 %v1052_v41, %v1051_v54 }
 0x31f   : > { %1025 = vst.msk [vmem:[#allocation3 + $0x5] sm:$0x1] %vm869_vm6, %v1024_v59  ;;  %v1083_v63 = vrot.slane %v1082_v60, 2  ;;  %v1054_v2 = vrot.slane %v1053_v61, 1 }
 0x321   : > { %v1084_v3 = vadd.f32 %v1083_v63, %v1082_v60  ;;  %v1055_v5 = vadd.f32 %v1054_v2, %v1053_v61 }
 0x323   : > { %v1085_v6 = vrot.slane %v1084_v3, 1  ;;  %1056 = vst.msk [vmem:[#allocation3 + $0x6] sm:$0x1] %vm869_vm6, %v1055_v5 }
 0x325   : > { %v1086_v7 = vadd.f32 %v1085_v6, %v1084_v3 }
 0x327   : > { %1087 = vst.msk [vmem:[#allocation3 + $0x7] sm:$0x1] %vm869_vm6, %v1086_v7 }
 0x32e   : > { %v1088_v9 = vld [vmem:[#allocation3] sm:$0xff] }
 0x32f   : > { %v1097_v11 = vadd.f32 %v1096_v49, %v1088_v9 }
 0x331   : > { %v1104_v12 = vmul.f32 %v1103_v10, %v1097_v11 }
 0x333   : > { %v1105_v13 = vpack.c.bf16 %v1104_v12, %v1104_v12 }
 0x335   : > { %1347 = vmatmul.mubr.msk.bf16.vlgmr.msra.gmra.mrb[12].mxu1 %vm555_vm2, %v1105_v13 }
 0x408   : > { %v1175_v14 = vpop.f32.mrb[12].mxu1 }
 0x409   : > { %1181 = vst.msk [vmem:[%s435_s20] sm:$0xff] %vm455_vm1, %v1175_v14  ;;  %v1348_v15 = vpop.f32.mrb[13].mxu1 }
 0x40a   : > { %v1178_v16 = vpop.f32.mrb[14].mxu1 }
 0x40b   : > { %v1349_v17 = vpop.f32.mrb[15].mxu1 }
 0x40c PF: > { %s23_s25 = sadd.s32 1, %s1431_s25  }
 0x40d   : > { %p20_p4 = scmp.ge.s32.totalorder %s23_s25, 4  }
 0x40f   :  { %22 = sbr.rel (!%p20_p4) target bundleno = 1 (0x1), region = 102 }

// kernel: view_mamba_aggregate2.7
= control target key start
LH: loop header
LB: loop body
LE: loop exit
PB: predicated region body
PF: predicated region fallthrough
CT: control target
= control target key end

     0   :  { %12 = vsyncpa [#allocation4], 0  ;;  %s1755_s0 = inlined_call_operand.vmem [shape: f32[2,8,32], index: 0, kind: input, shape index: {}]   ;;  %s1756_s1 = inlined_call_operand.vmem [shape: bf16[4,32,24], index: 1, kind: input, shape index: {}]   ;;  %s1757_s2 = inlined_call_operand.vmem [shape: f32[4,1,24], index: 2, kind: input, shape index: {}]   ;;  %s1758_s3 = inlined_call_operand.vmem [shape: bf16[32,32], index: 3, kind: input, shape index: {}]   ;;  %s1759_s4 = inlined_call_operand.vmem [shape: f32[1,32], index: 4, kind: input, shape index: {}]   ;;  %s1760_s5 = inlined_call_operand.vmem [shape: f32[1,32], index: 5, kind: input, shape index: {}]   ;;  %s1761_s6 = inlined_call_operand.vmem [shape: f32[1,32], index: 6, kind: input, shape index: {}]   ;;  %s1762_s7 = inlined_call_operand.hbm [shape: f32[2,1,32], index: 7, kind: output, shape index: {}]  }
   0x1   :  { %14 = vsyncpa [#allocation4 + $0x1], 0  ;;  %s1507_s24 = smov 0   ;;  %s1509_s25 = smov 0  }
   0x2   :  { %s1511_s26 = smov 0   ;;  %s1513_s27 = smov 0  }
   0x3 LB: > { %s1528_s28 = sadd.s32 4294967295, %s1457_s27   ;;  %s1166_s29 = sadd.s32 4294967294, %s1457_s27   ;;  %s1457_s27 = sphi %s1513_s27, %s1768_s27   ;;  %s1453_s26 = sphi %s1511_s26, %s1767_s26   ;;  %s1449_s25 = sphi %s1509_s25, %s1766_s25   ;;  %s1445_s24 = sphi %s1507_s24, %s1765_s24  }
   0x4   : > { %s1532_s30 = sadd.s32 1, %s1457_s27   ;;  %s179_s8 = sadd.s32 1, %s1453_s26 }
   0x5   : > { %s176_s9 = ssub.s32 %s1457_s27, %s1532_s30  ;;  %p189_p0 = scmp.ne.s32.totalorder %s1453_s26, %s1449_s25 }
   0x6   : > { %p177_p1 = scmp.eq.s32.totalorder %s176_s9, 0  ;;  %p190_p2 = scmp.eq.s32.totalorder %s1528_s28, 1 }
   0x7   : > { %p195_p3 = scmp.ne.s32.totalorder %s1449_s25, %s1445_s24  ;;  %p196_p4 = scmp.eq.s32.totalorder %s1166_s29, 1 }
   0x8   : > { %s1543_s10 = scalar_select %p177_p1, %s1453_s26, %s179_s8  }
   0x9   : > { %p1545_p5 = por %p190_p2, %p189_p0  ;;  %p1549_p6 = por %p196_p4, %p195_p3 }
   0xa   : > { %p1169_p7 = scmp.ge.s32.totalorder %s1457_s27, 1  ;;  %p239_p8 = scmp.lt.s32.totalorder %s1457_s27, 3 }
   0xc   : > { %p240_p9 = pnand %p1169_p7, %p239_p8 }
   0xd   : > { %v1367_v0 = vld [vmem:[%s1756_s1] sm:$0xff] (!%p240_p9)   ;;  %v1459_v1 = vmov (!%p240_p9), 0.0   ;;  %v1368_v2 = vld [vmem:[%s1756_s1 + $0x10] sm:$0xff] (!%p240_p9)   ;;  %v1369_v3 = vld [vmem:[%s1756_s1 + $0x8] sm:$0xff] (!%p240_p9)   ;;  %vm1460_vm0 = vmmov (!%p240_p9), 0   ;;  %p269_p10 = scmp.lt.s32.totalorder (!%p240_p9), %s1528_s28, 1 }
   0xe   : > { %243 = sbr.rel (%p240_p9) target bundleno = 1801 (0x709), region = 48  ;;  %1233 = vmatprep.subr.bf16.mxu0 (!%p240_p9), %v1459_v1  ;;  %1241 = vmatprep.subr.bf16.mxu1 (!%p240_p9), %v1459_v1  ;;  %v1370_v4 = vld [vmem:[%s1756_s1 + $0x18] sm:$0xff] (!%p240_p9)   ;;  %v1371_v5 = vld [vmem:[%s1756_s1 + $0x20] sm:$0xff] (!%p240_p9)   ;;  %vm332_vm1 = vcmask (!%p240_p9), 261120   ;;  %v1372_v7 = vld [vmem:[%s1756_s1 + $0x30] sm:$0xff] (!%p240_p9)   ;;  %s1461_s29 = smov (!%p240_p9), 120  }
   0xf   : > { %1234 = vmatpush3.bf16.msra.mxu0 (!%p240_p9), %v1367_v0  ;;  %1237 = vmatprep.mubr.msk.bf16.mxu0 (!%p240_p9), %vm1460_vm0, %v1459_v1  ;;  %v1373_v9 = vld [vmem:[%s1756_s1 + $0x28] sm:$0xff] (!%p240_p9)   ;;  %v1374_v10 = vld [vmem:[%s1756_s1 + $0x38] sm:$0xff] (!%p240_p9)   ;;  %v1171_v11 = vld [vmem:[%s1757_s2] ss:$0 sm:$0xff] (!%p240_p9)  ;;  %vm547_vm2 = vcmask (!%p240_p9), 64512   ;;  %s1462_s15 = smov (!%p240_p9), 112  }
  0x10   : > { %1242 = vmatpush3.bf16.msra.mxu1 (!%p240_p9), %v1368_v2  ;;  %1235 = vmatprep.subr.bf16.mxu0 (!%p240_p9), %v1459_v1  ;;  %v1172_v12 = vld [vmem:[%s1757_s2 + $0x1] ss:$0 sm:$0xff] (!%p240_p9)  ;;  %v1173_v25 = vld [vmem:[%s1757_s2 + $0x2] ss:$0 sm:$0xff] (!%p240_p9)  ;;  %v1174_v26 = vld [vmem:[%s1757_s2 + $0x3] ss:$0 sm:$0xff] (!%p240_p9) }
  0x11   : > { %1243 = vmatprep.subr.bf16.mxu1 (!%p240_p9), %v1459_v1  ;;  %1245 = vmatprep.mubr.msk.bf16.mxu1 (!%p240_p9), %vm1460_vm0, %v1459_v1  ;;  %vm794_vm3 = vcmask (!%p240_p9), 1043456   ;;  %s1463_s20 = smov (!%p240_p9), 8   ;;  %vm987_vm4 = vcmask (!%p240_p9), 130112   ;;  %vm993_vm5 = vcmask (!%p240_p9), 195712   ;;  %vm999_vm6 = vcmask (!%p240_p9), 261312   ;;  %s1199_s16 = sshll.u32 (!%p240_p9), %s1528_s28, 4 }
  0x12   : > { %vm1096_vm7 = vcmask (!%p240_p9), 253952  }
  0x13   : > { %1236 = vmatpush3.bf16.msra.mxu0 (!%p240_p9), %v1369_v3 }
  0x14   : > { %1244 = vmatpush3.bf16.msra.mxu1 (!%p240_p9), %v1370_v4  ;;  %1249 = vmatprep.subr.bf16.mxu0 (!%p240_p9), %v1459_v1 }
  0x15   : > { %s270_s21 = scalar_select %p269_p10, %s1528_s28, 1  ;;  %1257 = vmatprep.subr.bf16.mxu1 %v1459_v1 }
  0x16   : > { %s1466_s28 = smov [#allocation3]  }
  0x17   : > { %s1170_s22 = sshll.u32 %s270_s21, 3  ;;  %s1464_s21 = smov 16  }
  0x18   : > { %s272_s8 = scalar_lea.vmem %s1755_s0, %s1170_s22  ;;  %s1465_s22 = smov 24  }
  0x19   : > { %v274_v6 = vld [vmem:[%s272_s8] sm:$0xff]  ;;  %s267_s8 = sand.u32 1, %s1449_s25  }
  0x1a   : > { %v275_v8 = vpack.c.bf16 %v274_v6, %v274_v6  ;;  %s268_s17 = scalar_lea.vmem [#allocation3], %s267_s8 }
  0x1b   : > { %s1111_s18 = sshll.u32 %s268_s17, 4  ;;  %s1715_s18 = int_to_ptr.vmem [resolvable:$true] %s1111_s18 }
  0x1c   : > { %1238 = vmatmul.mubr.msk.bf16.vlgmr.msra.gmra.mrb[0].mxu0 %vm332_vm1, %v275_v8  ;;  %1246 = vmatmul.mubr.msk.bf16.vlgmr.msra.gmra.mrb[0].mxu1 %vm332_vm1, %v275_v8  ;;  %s1395_s23 = scalar_lea.vmem %s1715_s18, 16 }
  0x1d   : > { %1250 = vmatpush3.bf16.msra.mxu0 %v1371_v5  ;;  %1258 = vmatpush3.bf16.msra.mxu1 %v1372_v7  ;;  %p1396_p11 = scmp.ne.s32.totalorder %s1715_s18, %s1395_s23 }
  0x1e   : > { %1251 = vmatprep.subr.bf16.mxu0 %v1459_v1  ;;  %1259 = vmatprep.subr.bf16.mxu1 %v1459_v1 }
  0x1f   : > { %1253 = vmatprep.mubr.msk.bf16.mxu0 %vm1460_vm0, %v1459_v1  ;;  %1261 = vmatprep.mubr.msk.bf16.mxu1 %vm1460_vm0, %v1459_v1  ;;  %p1397_p12 = pnand %p1396_p11, %p1545_p5 }
  0x21   : > { %1252 = vmatpush3.bf16.msra.mxu0 %v1373_v9  ;;  %1260 = vmatpush3.bf16.msra.mxu1 %v1374_v10  ;;  %p1398_p13 = pneg %p1397_p12 }
  0x22   : > { %1265 = vmatprep.subr.bf16.mxu0 %v1459_v1  ;;  %1271 = vmatprep.subr.bf16.mxu1 %v1459_v1 }
  0x24   : > { %1254 = vmatmul.mubr.msk.bf16.vlgmr.msra.gmra.mrb[4].mxu0 %vm332_vm1, %v275_v8  ;;  %1262 = vmatmul.mubr.msk.bf16.vlgmr.msra.gmra.mrb[4].mxu1 %vm332_vm1, %v275_v8 }
  0x25   : > { %1267 = vmatprep.mubr.msk.bf16.mxu0 %vm1460_vm0, %v1459_v1  ;;  %1273 = vmatprep.mubr.msk.bf16.mxu1 %vm1460_vm0, %v1459_v1 }
  0xef   : > { %v370_v13 = vpop.f32.mrb[0].mxu0  ;;  %v422_v14 = vpop.f32.mrb[0].mxu1 }
  0xf0   : > { %v371_v15 = vadd.f32 %v1171_v11, %v370_v13  ;;  %v1239_v16 = vpop.f32.mrb[1].mxu0  ;;  %v423_v17 = vadd.f32 %v1172_v12, %v422_v14  ;;  %v1247_v18 = vpop.f32.mrb[1].mxu1 }
  0xf1   : > { %v373_v19 = vpop.f32.mrb[2].mxu0  ;;  %v425_v20 = vpop.f32.mrb[2].mxu1 }
  0xf2   : > { %v1240_v21 = vpop.f32.mrb[3].mxu0  ;;  %v1248_v22 = vpop.f32.mrb[3].mxu1  ;;  %v1616_v23 = vpack.c.bf16 %v371_v15, %v371_v15  ;;  %v1618_v24 = vpack.c.bf16 %v423_v17, %v423_v17  ;;  %v532_v41 = vmul.f32 0.35355338, %v371_v15  ;;  %v533_v45 = vmul.f32 0.35355338, %v423_v17 }
  0xf4   : > { %545 = vrot.lane.b32.xlu0 %v1616_v23, %s1461_s29  ;;  %v536_v44 = vpack.c.bf16 %v532_v41, %v532_v41  ;;  %v537_v48 = vpack.c.bf16 %v533_v45, %v533_v45 }
  0xf7   : > { %v474_v27 = vpop.f32.mrb[4].mxu0  ;;  %v526_v28 = vpop.f32.mrb[4].mxu1 }
  0xf8   : > { %v475_v29 = vadd.f32 %v1173_v25, %v474_v27  ;;  %v527_v30 = vadd.f32 %v1174_v26, %v526_v28  ;;  %595 = vrot.lane.b32.xlu0 %v1618_v24, %s1461_s29  ;;  %v1255_v31 = vpop.f32.mrb[5].mxu0  ;;  %v1263_v32 = vpop.f32.mrb[5].mxu1 }
  0xf9   : > { %v477_v33 = vpop.f32.mrb[6].mxu0  ;;  %v529_v34 = vpop.f32.mrb[6].mxu1 }
  0xfa   : > { %v1256_v35 = vpop.f32.mrb[7].mxu0  ;;  %v1264_v36 = vpop.f32.mrb[7].mxu1  ;;  %v1628_v37 = vpack.c.bf16 %v475_v29, %v475_v29  ;;  %v1630_v38 = vpack.c.bf16 %v527_v30, %v527_v30  ;;  %v534_v49 = vmul.f32 0.35355338, %v475_v29  ;;  %v535_v53 = vmul.f32 0.35355338, %v527_v30 }
  0xfc   : > { %644 = vrot.lane.b32.xlu1 %v1628_v37, %s1461_s29  ;;  %v538_v52 = vpack.c.bf16 %v534_v49, %v534_v49  ;;  %v539_v54 = vpack.c.bf16 %v535_v53, %v535_v53 }
 0x100   : > { %693 = vrot.lane.b32.xlu1 %v1630_v38, %s1461_s29  ;;  %s1399_s29 = sshll.u32 %s1466_s28, 4  ;;  %s1400_s29 = int_to_ptr.vmem [resolvable:$false] %s1399_s29 }
 0x101   : > { %s1401_s9 = scalar_lea.vmem %s1400_s29, 32  ;;  %p1402_p0 = scmp.lt.s32.totalorder %s1715_s18, %s1400_s29 }
 0x102   : > { %p1403_p1 = scmp.lt.s32.totalorder %s1401_s9, %s1395_s23 }
 0x104   : > { %p1404_p2 = por %p1403_p1, %p1402_p0 }
 0x106   : > { %p1405_p3 = pnand %p1404_p2, %p1398_p13 }
 0x166   : > { %v546_v39 = vpop.permute.xlu0 %545 }
 0x167   : > { %v552_v40 = vsel %vm547_vm2, %v546_v39, 0 }
 0x168   : > { %1266 = vmatpush3.bf16.xpose.msra.mxu0 %v552_v40 }
 0x169   : > { %1277 = vmatprep.subr.bf16.mxu0 %v1459_v1 }
 0x16a   : > { %v596_v42 = vpop.permute.xlu0 %595 }
 0x16b   : > { %v601_v43 = vsel %vm547_vm2, %v596_v42, 0 }
 0x16c   : > { %1272 = vmatpush3.bf16.xpose.msra.mxu1 %v601_v43 }
 0x16d   : > { %1283 = vmatprep.subr.bf16.mxu1 %v1459_v1 }
 0x16e   : > { %v645_v46 = vpop.permute.xlu1 %644 }
 0x16f   : > { %v650_v47 = vsel %vm547_vm2, %v645_v46, 0  ;;  %1268 = vmatmul.mubr.msk.bf16.vlgmr.msra.gmra.mrb[8].mxu0 %vm547_vm2, %v536_v44 }
 0x170   : > { %1278 = vmatpush3.bf16.xpose.msra.mxu0 %v650_v47  ;;  %1279 = vmatprep.mubr.msk.bf16.mxu0 %vm1460_vm0, %v1459_v1 }
 0x171   : > { %1289 = vmatprep.subr.bf16.mxu0 %v1459_v1 }
 0x172   : > { %v694_v50 = vpop.permute.xlu1 %693 }
 0x173   : > { %v699_v51 = vsel %vm547_vm2, %v694_v50, 0  ;;  %1274 = vmatmul.mubr.msk.bf16.vlgmr.msra.gmra.mrb[8].mxu1 %vm547_vm2, %v537_v48 }
 0x174   : > { %1284 = vmatpush3.bf16.xpose.msra.mxu1 %v699_v51  ;;  %1285 = vmatprep.mubr.msk.bf16.mxu1 %vm1460_vm0, %v1459_v1 }
 0x175   : > { %1295 = vmatprep.subr.bf16.mxu1 %v1459_v1 }
 0x177   : > { %1280 = vmatmul.mubr.msk.bf16.vlgmr.msra.gmra.mrb[12].mxu0 %vm547_vm2, %v538_v52 }
 0x178   : > { %1291 = vmatprep.mubr.msk.bf16.mxu0 %vm1460_vm0, %v1459_v1 }
 0x17b   : > { %1286 = vmatmul.mubr.msk.bf16.vlgmr.msra.gmra.mrb[12].mxu1 %vm547_vm2, %v539_v54 }
 0x17c   : > { %1297 = vmatprep.mubr.msk.bf16.mxu1 %vm1460_vm0, %v1459_v1 }
 0x242   : > { %v588_v55 = vpop.f32.mrb[8].mxu0 }
 0x243   : > { %v1269_v56 = vpop.f32.mrb[9].mxu0  ;;  %v741_v57 = vsel %vm547_vm2, %v588_v55, -inf }
 0x244   : > { %742 = vmax.xlane.f32.xlu0 %v741_v57  ;;  %v591_v58 = vpop.f32.mrb[10].mxu0 }
 0x245   : > { %v1270_v59 = vpop.f32.mrb[11].mxu0  ;;  %v1375_v58 = vld [vmem:[%s1758_s3] sm:$0xff]  }
 0x246   : > { %v637_v60 = vpop.f32.mrb[8].mxu1 }
 0x247   : > { %v1275_v61 = vpop.f32.mrb[9].mxu1  ;;  %v744_v62 = vsel %vm547_vm2, %v637_v60, -inf }
 0x248   : > { %v640_v63 = vpop.f32.mrb[10].mxu1  ;;  %745 = vmax.xlane.f32.xlu1 %v744_v62  ;;  %v1376_v61 = vld [vmem:[%s1758_s3 + $0x8] sm:$0xff]  }
 0x249   : > { %v1276_v0 = vpop.f32.mrb[11].mxu1 }
 0x24a   : > { %v686_v2 = vpop.f32.mrb[12].mxu0 }
 0x24b   : > { %v1281_v3 = vpop.f32.mrb[13].mxu0  ;;  %v747_v4 = vsel %vm547_vm2, %v686_v2, -inf }
 0x24c   : > { %748 = vmax.xlane.f32.xlu0 %v747_v4  ;;  %v689_v5 = vpop.f32.mrb[14].mxu0 }
 0x24d   : > { %v1282_v6 = vpop.f32.mrb[15].mxu0 }
 0x24e   : > { %v735_v7 = vpop.f32.mrb[12].mxu1 }
 0x24f   : > { %v1287_v8 = vpop.f32.mrb[13].mxu1  ;;  %v750_v9 = vsel %vm547_vm2, %v735_v7, -inf }
 0x250   : > { %v738_v10 = vpop.f32.mrb[14].mxu1  ;;  %751 = vmax.xlane.f32.xlu0 %v750_v9 }
 0x251   : > { %v1288_v11 = vpop.f32.mrb[15].mxu1 }
 0x259   : > { %789 = vrot.lane.b32.xlu1 %v1616_v23, %s1462_s15 }
 0x2d1   : > { %v743_v12 = vpop.xlane.xlu0 %742 }
 0x2d2   : > { %v753_v13 = vsub.f32 %v588_v55, %v743_v12 }
 0x2d4   : > { %v757_v14 = vmul.f32 1.442695, %v753_v13 }
 0x2d5   : > { %v746_v15 = vpop.xlane.xlu1 %745 }
 0x2d6   : > { %1377 = vpow2.f32 %v757_v14  ;;  %v754_v16 = vsub.f32 %v637_v60, %v746_v15  ;;  %v1195_v15 = vld [vmem:[%s1759_s4] ss:$0 sm:$0xff] }
 0x2d8   : > { %v759_v17 = vmul.f32 1.442695, %v754_v16 }
 0x2d9   : > { %v790_v18 = vpop.permute.xlu1 %789  ;;  %v749_v19 = vpop.xlane.xlu0 %748 }
 0x2da   : > { %1379 = vpow2.f32 %v759_v17  ;;  %v796_v20 = vsel %vm794_vm3, %v790_v18, 0  ;;  %v755_v21 = vsub.f32 %v686_v2, %v749_v19 }
 0x2db   : > { %1290 = vmatpush3.bf16.msra.mxu0 %v796_v20 }
 0x2dc   : > { %v761_v22 = vmul.f32 1.442695, %v755_v21  ;;  %1301 = vmatprep.subr.bf16.mxu0 %v1459_v1 }
 0x2dd   : > { %v752_v25 = vpop.xlane.xlu0 %751 }
 0x2de   : > { %1381 = vpow2.f32 %v761_v22  ;;  %v756_v23 = vsub.f32 %v735_v7, %v752_v25 }
 0x2e0   : > { %v1378_v26 = vpop.eup %1377  ;;  %v763_v27 = vmul.f32 1.442695, %v756_v23 }
 0x2e1   : > { %v765_v28 = vsel %vm547_vm2, %v1378_v26, 0.0 }
 0x2e2   : > { %1383 = vpow2.f32 %v763_v27  ;;  %766 = vadd.xlane.f32.xlu1 %v765_v28 }
 0x2e4   : > { %v1380_v29 = vpop.eup %1379 }
 0x2e5   : > { %v768_v30 = vsel %vm547_vm2, %v1380_v29, 0.0 }
 0x2e6   : > { %769 = vadd.xlane.f32.xlu0 %v768_v30 }
 0x2e8   : > { %v1382_v31 = vpop.eup %1381 }
 0x2e9   : > { %v771_v32 = vsel %vm547_vm2, %v1382_v31, 0.0 }
 0x2ea   : > { %772 = vadd.xlane.f32.xlu1 %v771_v32 }
 0x2ec   : > { %v1384_v33 = vpop.eup %1383 }
 0x2ed   : > { %v774_v34 = vsel %vm547_vm2, %v1384_v33, 0.0 }
 0x2ee   : > { %775 = vadd.xlane.f32.xlu0 %v774_v34 }
 0x2fb   : > { %886 = vrot.lane.b32.xlu1 %v1628_v37, %s1462_s15 }
 0x2ff   : > { %934 = vrot.lane.b32.xlu1 %v1630_v38, %s1462_s15 }
 0x304   : > { %838 = vrot.lane.b32.xlu0 %v1618_v24, %s1462_s15 }
 0x36f   : > { %v767_v35 = vpop.xlane.xlu1 %766 }
 0x370   : > { %1385 = vrcp.f32 %v767_v35 }
 0x373   : > { %v770_v36 = vpop.xlane.xlu0 %769 }
 0x374   : > { %1387 = vrcp.f32 %v770_v36 }
 0x377   : > { %v773_v39 = vpop.xlane.xlu1 %772 }
 0x378   : > { %1389 = vrcp.f32 %v773_v39 }
 0x37a   : > { %v1386_v40 = vpop.eup %1385 }
 0x37b   : > { %v781_v41 = vmul.f32 %v1386_v40, %v1378_v26  ;;  %v887_v42 = vpop.permute.xlu1 %886  ;;  %v776_v43 = vpop.xlane.xlu0 %775 }
 0x37c   : > { %1391 = vrcp.f32 %v776_v43  ;;  %v892_v46 = vsel %vm794_vm3, %v887_v42, 0  ;;  %v1078_v42 = vld [vmem:[%s1760_s5] sm:$0x1] }
 0x37d   : > { %v785_v44 = vpack.c.bf16 %v781_v41, %v781_v41 }
 0x37e   : > { %v1388_v45 = vpop.eup %1387 }
 0x37f   : > { %v782_v37 = vmul.f32 %v1388_v45, %v1380_v29  ;;  %1292 = vmatmul.mubr.msk.bf16.vlgmr.msra.gmra.mrb[16].mxu0 %vm547_vm2, %v785_v44  ;;  %v839_v38 = vpop.permute.xlu0 %838  ;;  %v935_v47 = vpop.permute.xlu1 %934  ;;  %v1079_v44 = vld [vmem:[%s1761_s6] sm:$0x1] }
 0x380   : > { %1302 = vmatpush3.bf16.msra.mxu0 %v892_v46  ;;  %v844_v24 = vsel %vm794_vm3, %v839_v38, 0  ;;  %1303 = vmatprep.mubr.msk.bf16.mxu0 %vm1460_vm0, %v1459_v1  ;;  %v940_v51 = vsel %vm794_vm3, %v935_v47, 0 }
 0x381   : > { %1296 = vmatpush3.bf16.msra.mxu1 %v844_v24  ;;  %v786_v48 = vpack.c.bf16 %v782_v37, %v782_v37  ;;  %1313 = vmatprep.subr.bf16.mxu0 %v1459_v1 }
 0x382   : > { %v1390_v49 = vpop.eup %1389  ;;  %1307 = vmatprep.subr.bf16.mxu1 %v1459_v1 }
 0x383   : > { %v783_v50 = vmul.f32 %v1390_v49, %v1382_v31 }
 0x384   : > { %1298 = vmatmul.mubr.msk.bf16.vlgmr.msra.gmra.mrb[16].mxu1 %vm547_vm2, %v786_v48 }
 0x385   : > { %1308 = vmatpush3.bf16.msra.mxu1 %v940_v51  ;;  %v787_v52 = vpack.c.bf16 %v783_v50, %v783_v50  ;;  %1309 = vmatprep.mubr.msk.bf16.mxu1 %vm1460_vm0, %v1459_v1 }
 0x386   : > { %v1392_v53 = vpop.eup %1391 }
 0x387   : > { %v784_v54 = vmul.f32 %v1392_v53, %v1384_v33  ;;  %1304 = vmatmul.mubr.msk.bf16.vlgmr.msra.gmra.mrb[20].mxu0 %vm547_vm2, %v787_v52 }
 0x388   : > { %1317 = vmatprep.mubr.msk.bf16.mxu0 %vm1460_vm0, %v1459_v1  ;;  %1314 = vmatpush3.bf16.msra.mxu0 %v1375_v58 }
 0x389   : > { %v788_v55 = vpack.c.bf16 %v784_v54, %v784_v54  ;;  %1315 = vmatprep.subr.bf16.mxu0 %v1459_v1 }
 0x38c   : > { %1310 = vmatmul.mubr.msk.bf16.vlgmr.msra.gmra.mrb[20].mxu1 %vm547_vm2, %v788_v55  ;;  %1316 = vmatpush3.bf16.msra.mxu0 %v1376_v61 }
 0x452   : > { %v832_v56 = vpop.f32.mrb[16].mxu0 }
 0x453   : > { %982 = vst.msk [vmem:[#allocation2] sm:$0xff] %vm547_vm2, %v832_v56  ;;  %v1293_v57 = vpop.f32.mrb[17].mxu0 }
 0x454   : > { %v835_v59 = vpop.f32.mrb[18].mxu0 }
 0x455   : > { %v1294_v60 = vpop.f32.mrb[19].mxu0 }
 0x457   : > { %v880_v62 = vpop.f32.mrb[16].mxu1 }
 0x458   : > { %984 = vrot.lane.b32.xlu0 %v880_v62, %s1463_s20  ;;  %v1299_v63 = vpop.f32.mrb[17].mxu1 }
 0x459   : > { %v883_v0 = vpop.f32.mrb[18].mxu1 }
 0x45a   : > { %v1300_v2 = vpop.f32.mrb[19].mxu1  ;;  %v928_v3 = vpop.f32.mrb[20].mxu0 }
 0x45b   : > { %990 = vrot.lane.b32.xlu1 %v928_v3, %s1464_s21  ;;  %v1305_v4 = vpop.f32.mrb[21].mxu0  ;;  %s1713_s21 = scalar_lea.hbm %s1762_s7, %s1199_s16 }
 0x45c   : > { %v931_v5 = vpop.f32.mrb[22].mxu0 }
 0x45d   : > { %v1306_v6 = vpop.f32.mrb[23].mxu0 }
 0x45f   : > { %v976_v7 = vpop.f32.mrb[20].mxu1 }
 0x460   : > { %996 = vrot.lane.b32.xlu0 %v976_v7, %s1465_s22  ;;  %v1311_v8 = vpop.f32.mrb[21].mxu1  ;;  %s1099_s22 = scalar_lea.sflag [#allocation4], %s267_s8 }
 0x461   : > { %v979_v9 = vpop.f32.mrb[22].mxu1 }
 0x462   : > { %v1312_v10 = vpop.f32.mrb[23].mxu1 }
 0x4ca   : > { %v985_v1 = vpop.permute.xlu0 %984 }
 0x4cb   : > { %988 = vst.msk [vmem:[#allocation2] sm:$0xff] %vm987_vm4, %v985_v1 }
 0x4cd   : > { %v991_v11 = vpop.permute.xlu1 %990 }
 0x4ce   : > { %994 = vst.msk [vmem:[#allocation2] sm:$0xff] %vm993_vm5, %v991_v11 }
 0x4d2   : > { %v997_v12 = vpop.permute.xlu0 %996 }
 0x4d3   : > { %1000 = vst.msk [vmem:[#allocation2] sm:$0xff] %vm999_vm6, %v997_v12 }
 0x4da   : > { %v1001_v13 = vld [vmem:[#allocation2] sm:$0xff] }
 0x4db   : > { %v1002_v14 = vpack.c.bf16 %v1001_v13, %v1001_v13 }
 0x4dd   : > { %1318 = vmatmul.mubr.msk.bf16.vlgmr.msra.gmra.mrb[24].mxu0 %vm332_vm1, %v1002_v14 }
 0x5b0   : > { %v1063_v16 = vpop.f32.mrb[24].mxu0 }
 0x5b1   : > { %v1064_v17 = vadd.f32 %v1195_v15, %v1063_v16  ;;  %v1319_v18 = vpop.f32.mrb[25].mxu0 }
 0x5b2   : > { %v1066_v19 = vpop.f32.mrb[26].mxu0 }
 0x5b3   : > { %v1069_v20 = vsel %vm332_vm1, %v1064_v17, 0.0  ;;  %v1320_v21 = vpop.f32.mrb[27].mxu0 }
 0x5b4   : > { %v1070_v22 = vrot.slane %v1069_v20, 4 }
 0x5b6   : > { %v1071_v25 = vadd.f32 %v1070_v22, %v1069_v20 }
 0x5b8   : > { %v1072_v23 = vrot.slane %v1071_v25, 2 }
 0x5ba   : > { %v1073_v26 = vadd.f32 %v1072_v23, %v1071_v25 }
 0x5bc   : > { %v1074_v27 = vrot.slane %v1073_v26, 1 }
 0x5be   : > { %v1075_v28 = vadd.f32 %v1074_v27, %v1073_v26 }
 0x5c0   : > { %v1077_v29 = vmul.f32 0.125, %v1075_v28 }
 0x5c2   : > { %v1080_v30 = vsel %vm332_vm1, %v1077_v29, 0.0 }
 0x5c3   : > { %1081 = vadd.xlane.f32.xlu1 %v1080_v30 }
 0x650   : > { %v1082_v31 = vpop.xlane.xlu1 %1081 }
 0x651   : > { %v1084_v32 = vmul.f32 0.03125, %v1082_v31 }
 0x653   : > { %v1085_v33 = vsub.f32 %v1077_v29, %v1084_v32 }
 0x655   : > { %v1086_v34 = vmul.f32 %v1085_v33, %v1085_v33 }
 0x657   : > { %v1087_v35 = vsel %vm332_vm1, %v1086_v34, 0.0 }
 0x658   : > { %1088 = vadd.xlane.f32.xlu0 %v1087_v35 }
 0x6e5   : > { %v1089_v36 = vpop.xlane.xlu0 %1088 }
 0x6e6   : > { %v1090_v39 = vmul.f32 0.03125, %v1089_v36 }
 0x6e8   : > { %v1091_v40 = vadd.f32 1e-05, %v1090_v39 }
 0x6ea   : > { %1393 = vrsqrt.f32 %v1091_v40 }
 0x6f4   : > { %v1394_v41 = vpop.eup %1393 }
 0x6f5   : > { %v1093_v43 = vmul.f32 %v1394_v41, %v1085_v33 }
 0x6f7   : > { %v1094_v45 = vmul.f32 %v1093_v43, %v1078_v42 }
 0x6f9   : > { %v1095_v37 = vadd.f32 %v1094_v45, %v1079_v44 }
 0x6fb   : > { %1097 = vst.msk [vmem:[%s268_s17] sm:$0x1] %vm1096_vm7, %v1095_v37 }
 0x6fc   : > { %1408 = shalt.err (!%p1405_p3)
}
 0x6fd   : > { %s1409_s8 = scalar_lea.hbm %s1713_s21, 16  ;;  %s1413_s15 = scalar_lea.hbm %s1762_s7, 32 }
 0x6fe   : > { %p1410_p4 = scmp.ne.s32.totalorder %s1713_s21, %s1409_s8  ;;  %p1414_p9 = scmp.lt.u32.totalorder %s1713_s21, %s1762_s7 }
 0x6ff   : > { %p1415_p10 = scmp.lt.u32.totalorder %s1413_s15, %s1409_s8  ;;  %p1417_p12 = scmp.lt.u32.totalorder %s1409_s8, %s1713_s21 }
 0x700   : > { %p1411_p7 = pnand %p1410_p4, %p1545_p5 }
 0x701   : > { %p1416_p11 = por %p1415_p10, %p1414_p9 }
 0x702   : > { %p1412_p8 = pneg %p1411_p7 }
 0x703   : > { %p1418_p13 = por %p1417_p12, %p1416_p11 }
 0x705   : > { %p1419_p0 = pnand %p1418_p13, %p1412_p8 }
 0x707   : > { %1422 = shalt.err (!%p1419_p0)
}
 0x708   : > { %1321 = dma.vmem_to_hbm [thread:$0]  (%p1545_p5), %s1715_s18, 16, %s1713_s21, %s1099_s22  }
 0x709 PF: > { %p1327_p1 = scmp.ge.s32.totalorder %s1457_s27, 2  ;;  %s1123_s19 = sand.u32 1, %s1445_s24  }
 0x70a   : > { %s1124_s20 = scalar_lea.sflag [#allocation4], %s1123_s19 }
 0x70b   : > { %p1324_p2 = pnand %p1327_p1, %p1549_p6 }
 0x70d   : > { %1440 = dma.done.wait (!%p1324_p2), %s1124_s20, 16  }
 0x70e   : > { %1442 = vsyncadd (!%p1324_p2), %s1124_s20, 4294967280  ;;  %p17_p3 = scmp.ge.s32.totalorder %s1532_s30, 4   ;;  %s1765_s24 = smov %s1449_s25 }
 0x70f   : > { %s1766_s25 = smov %s1453_s26  ;;  %s1767_s26 = smov %s1543_s10 }
 0x710   : > { %s1768_s27 = smov %s1532_s30  ;;  %19 = sbr.rel (!%p17_p3) target bundleno = 3 (0x3), region = 83 }
 0x717   :  { %1128 = vsyncpa [#allocation4], 1 }
 0x718   :  { %1130 = vsyncpa [#allocation4 + $0x1], 1 }

</bundles_post_ra>
